<compile_context>
chip_gen: v5e
topology: v5e:2x2
jax: 0.10.0
libtpu: 0.0.40
codegen_flags: <defaults>
</compile_context>

<pallas_src>
import functools

import jax
import jax.numpy as jnp
from jax import lax
from jax.experimental import pallas as pl
from jax.experimental.pallas import tpu as pltpu


def _pick_tile(n, candidates=(256, 128, 64)):
    for c in candidates:
        if n % c == 0:
            return c
    return n


def _kv_proj_kernel(x_ref, wkv_ref, o_ref):
    # x_ref: (1, T, C), wkv_ref: (C, 2C), o_ref: (1, T, 2C)
    o_ref[0] = jnp.dot(x_ref[0], wkv_ref[...],
                       preferred_element_type=jnp.float32).astype(o_ref.dtype)


def _sr_norm_kv_kernel(xp_ref, wsr_ref, bsr_ref, g_ref, b_ref, wkv_ref, o_ref, *, eps):
    # xp_ref: (1, Tkv, P) channels-last conv patches, wsr_ref: (P, C),
    # bsr/g/b: (1, C), wkv_ref: (C, 2C), o_ref: (1, Tkv, 2C)
    y = jnp.dot(xp_ref[0], wsr_ref[...], preferred_element_type=jnp.float32)
    y = y + bsr_ref[...].astype(jnp.float32)
    mu = jnp.mean(y, axis=-1, keepdims=True)
    var = jnp.mean(y * y, axis=-1, keepdims=True) - mu * mu          # one-pass variance
    yn = (y - mu) * lax.rsqrt(var + eps)
    yn = yn * g_ref[...].astype(jnp.float32) + b_ref[...].astype(jnp.float32)
    o_ref[0] = jnp.dot(yn.astype(wkv_ref.dtype), wkv_ref[...],
                       preferred_element_type=jnp.float32).astype(o_ref.dtype)


def _attention_kernel(x_ref, kv_ref, wq_ref, wp_ref, bp_ref, o_ref, *,
                      scale, num_heads, head_dim):
    # x_ref:  (1, TQ, C)     query-tile tokens
    # kv_ref: (1, Nkv, 2C)   [K | V] for the whole (reduced) sequence, per batch
    # wq_ref: (C, C), wp_ref: (C, C), bp_ref: (1, C), o_ref: (1, TQ, C)
    cdt = x_ref.dtype
    C = num_heads * head_dim

    x = x_ref[0]                                           # (TQ, C)
    kv = kv_ref[0]                                         # (Nkv, 2C)

    # Full-width Q projection; softmax scale fused in on the f32 accumulator.
    q_full = (jnp.dot(x, wq_ref[...], preferred_element_type=jnp.float32)
              * scale).astype(cdt)                         # (TQ, C)

    ctxs = []
    for h in range(num_heads):                             # static unroll over heads
        lo, hi = h * head_dim, (h + 1) * head_dim
        q = q_full[:, lo:hi]                               # (TQ, hd)
        k = kv[:, lo:hi]                                   # (Nkv, hd)
        v = kv[:, C + lo:C + hi]                           # (Nkv, hd)

        # Scores: contract head_dim of both operands (no materialized transpose).
        s = lax.dot_general(q, k, (((1,), (1,)), ((), ())),
                            preferred_element_type=jnp.float32)   # (TQ, Nkv)
        s = s - jnp.max(s, axis=-1, keepdims=True)
        p = jnp.exp(s)
        inv_l = pl.reciprocal(jnp.sum(p, axis=-1, keepdims=True), approx=True)

        ctx = jnp.dot(p.astype(cdt), v, preferred_element_type=jnp.float32)  # (TQ, hd)
        ctxs.append((ctx * inv_l).astype(cdt))             # normalize on the narrow tile

    ctx = jnp.concatenate(ctxs, axis=-1)                   # (TQ, C)

    # Full-width output projection + bias.
    out = jnp.dot(ctx, wp_ref[...], preferred_element_type=jnp.float32)
    o_ref[0] = (out + bp_ref[...].astype(jnp.float32)).astype(o_ref.dtype)


def init_params(key, C, sr_ratio):
    ks = jax.random.split(key, 8)
    s = 0.05
    params = {
        # stored transposed relative to PyTorch nn.Linear (we use x @ W)
        "wq": jax.random.normal(ks[0], (C, C), jnp.float32) * s,
        "wkv": jax.random.normal(ks[1], (C, 2 * C), jnp.float32) * s,
        "wproj": jax.random.normal(ks[2], (C, C), jnp.float32) * s,
        "bproj": jax.random.normal(ks[3], (1, C), jnp.float32) * s,
    }
    if sr_ratio > 1:
        r = sr_ratio
        params["wsr"] = jax.random.normal(ks[4], (C, C, r, r, r), jnp.float32) * s  # (O, I, kd, kh, kw)
        params["bsr"] = jax.random.normal(ks[5], (1, C), jnp.float32) * s
        params["ln_g"] = 1.0 + 0.1 * jax.random.normal(ks[6], (1, C), jnp.float32)
        params["ln_b"] = 0.1 * jax.random.normal(ks[7], (1, C), jnp.float32)
    return params


def _attention_forward(x, params, spatial, num_heads, sr_ratio):
    B, N, C = x.shape
    D, H, W = spatial
    assert N == D * H * W and C % num_heads == 0
    hd = C // num_heads
    scale = hd ** (-0.5)
    dt = x.dtype
    cp = dict(vmem_limit_bytes=48 * 1024 * 1024)

    wkv = params["wkv"].astype(dt)                                   # (C, 2C)

    if sr_ratio > 1:
        r = sr_ratio
        # Non-overlapping patch extraction with channels kept LAST (lane-dense);
        # patch vector ordered (kd, kh, kw, c).
        xg = x.reshape(B, D // r, r, H // r, r, W // r, r, C)
        xg = xg.transpose(0, 1, 3, 5, 2, 4, 6, 7)        # (B, D', H', W', r, r, r, C)
        Nkv = (D // r) * (H // r) * (W // r)
        P = C * r ** 3
        xp = xg.reshape(B, Nkv, P)
        # Conv3d weight (O, I, kd, kh, kw) -> (kd, kh, kw, I, O) -> (P, C)
        wsr = params["wsr"].transpose(2, 3, 4, 1, 0).reshape(P, C).astype(dt)

        tkv = _pick_tile(Nkv)
        kv = pl.pallas_call(
            functools.partial(_sr_norm_kv_kernel, eps=1e-5),
            out_shape=jax.ShapeDtypeStruct((B, Nkv, 2 * C), dt),
            grid=(B, Nkv // tkv),
            in_specs=[
                pl.BlockSpec((1, tkv, P), lambda b, t: (b, t, 0)),
                pl.BlockSpec((P, C), lambda b, t: (0, 0)),
                pl.BlockSpec((1, C), lambda b, t: (0, 0)),
                pl.BlockSpec((1, C), lambda b, t: (0, 0)),
                pl.BlockSpec((1, C), lambda b, t: (0, 0)),
                pl.BlockSpec((C, 2 * C), lambda b, t: (0, 0)),
            ],
            out_specs=pl.BlockSpec((1, tkv, 2 * C), lambda b, t: (b, t, 0)),
            compiler_params=pltpu.CompilerParams(
                dimension_semantics=("parallel", "parallel"), **cp),
        )(xp, wsr, params["bsr"].astype(dt), params["ln_g"].astype(dt),
          params["ln_b"].astype(dt), wkv)
    else:
        Nkv = N
        tkv = _pick_tile(N)
        kv = pl.pallas_call(
            _kv_proj_kernel,
            out_shape=jax.ShapeDtypeStruct((B, N, 2 * C), dt),
            grid=(B, N // tkv),
            in_specs=[
                pl.BlockSpec((1, tkv, C), lambda b, t: (b, t, 0)),
                pl.BlockSpec((C, 2 * C), lambda b, t: (0, 0)),
            ],
            out_specs=pl.BlockSpec((1, tkv, 2 * C), lambda b, t: (b, t, 0)),
            compiler_params=pltpu.CompilerParams(
                dimension_semantics=("parallel", "parallel"), **cp),
        )(x, wkv)

    tq = _pick_tile(N)
    out = pl.pallas_call(
        functools.partial(_attention_kernel, scale=scale,
                          num_heads=num_heads, head_dim=hd),
        out_shape=jax.ShapeDtypeStruct((B, N, C), dt),
        grid=(B, N // tq),
        in_specs=[
            pl.BlockSpec((1, tq, C), lambda b, qt: (b, qt, 0)),
            pl.BlockSpec((1, Nkv, 2 * C), lambda b, qt: (b, 0, 0)),
            pl.BlockSpec((C, C), lambda b, qt: (0, 0)),
            pl.BlockSpec((C, C), lambda b, qt: (0, 0)),
            pl.BlockSpec((1, C), lambda b, qt: (0, 0)),
        ],
        out_specs=pl.BlockSpec((1, tq, C), lambda b, qt: (b, qt, 0)),
        compiler_params=pltpu.CompilerParams(
            dimension_semantics=("parallel", "parallel"), **cp),
    )(x, kv, params["wq"].astype(dt), params["wproj"].astype(dt),
      params["bproj"].astype(dt))
    return out


attention_forward = jax.jit(_attention_forward, static_argnums=(2, 3, 4))


def attention_reference(x, params, spatial, num_heads, sr_ratio):
    """Pure-JAX mirror of the PyTorch forward (eval mode, dropout p=0)."""
    B, N, C = x.shape
    hd = C // num_heads
    scale = hd ** (-0.5)
    q = (x @ params["wq"]).reshape(B, N, num_heads, hd).transpose(0, 2, 1, 3)
    if sr_ratio > 1:
        D, H, W = spatial
        r = sr_ratio
        x_ = x.transpose(0, 2, 1).reshape(B, C, D, H, W)
        x_ = jax.lax.conv_general_dilated(
            x_, params["wsr"], window_strides=(r, r, r), padding="VALID",
            dimension_numbers=("NCDHW", "OIDHW", "NCDHW"))
        x_ = x_ + params["bsr"].reshape(1, C, 1, 1, 1)
        x_ = x_.reshape(B, C, -1).transpose(0, 2, 1)
        mu = x_.mean(-1, keepdims=True)
        var = ((x_ - mu) ** 2).mean(-1, keepdims=True)
        x_ = (x_ - mu) / jnp.sqrt(var + 1e-5) * params["ln_g"] + params["ln_b"]
        kv_src = x_
    else:
        kv_src = x
    kv = (kv_src @ params["wkv"]).reshape(B, -1, 2, num_heads, hd).transpose(2, 0, 3, 1, 4)
    k, v = kv[0], kv[1]
    attn = jnp.einsum("bhqd,bhkd->bhqk", q, k) * scale
    attn = jax.nn.softmax(attn, axis=-1)
    out = jnp.einsum("bhqk,bhkd->bhqd", attn, v).transpose(0, 2, 1, 3).reshape(B, N, C)
    return out @ params["wproj"] + params["bproj"]


if __name__ == "__main__":
    B, C, num_heads = 2, 32, 4
    spatial = (4, 4, 4)                      # N = 64
    N = spatial[0] * spatial[1] * spatial[2]

    key = jax.random.PRNGKey(0)
    kx, kp1, kp2 = jax.random.split(key, 3)
    x = jax.random.normal(kx, (B, N, C), jnp.float32)

    for sr, kp in ((1, kp1), (2, kp2)):      # exercise both forward branches
        params = init_params(kp, C, sr)
        ref = attention_reference(x, params, spatial, num_heads, sr)

        # f32 inputs (native dtype fed to the MXU, f32 accumulation)
        out = jax.block_until_ready(attention_forward(x, params, spatial, num_heads, sr))
        assert out.shape == (B, N, C)
        assert jnp.allclose(out, ref, atol=5e-3, rtol=5e-3), f"f32 mismatch sr_ratio={sr}"

        # bf16 inputs/weights (bf16 MXU feed, f32 accumulation inside the kernels)
        x_bf = x.astype(jnp.bfloat16)
        p_bf = jax.tree_util.tree_map(lambda a: a.astype(jnp.bfloat16), params)
        out_bf = jax.block_until_ready(
            attention_forward(x_bf, p_bf, spatial, num_heads, sr))
        assert out_bf.dtype == jnp.bfloat16
        assert jnp.allclose(out_bf.astype(jnp.float32), ref, atol=6e-2, rtol=6e-2), \
            f"bf16 mismatch sr_ratio={sr}"

    print("KERNEL_OK")
</pallas_src>

<mosaic_0001>
module attributes {stable_mosaic.version = 11 : i64} {
  func.func @_kv_proj_kernel(%arg0: i32, %arg1: i32, %arg2: memref<1x64x32xf32, #tpu.memory_space<vmem>>, %arg3: memref<32x64xf32, #tpu.memory_space<vmem>>, %arg4: memref<1x64x64xf32, #tpu.memory_space<vmem>>) attributes {dimension_semantics = [#tpu.dimension_semantics<parallel>, #tpu.dimension_semantics<parallel>], iteration_bounds = array<i64: 2, 1>, scalar_prefetch = 0 : i64, scratch_operands = 0 : i64, tpu.core_type = #tpu.core_type<tc>, window_params = [{transform_indices = @transform_0, window_bounds = array<i64: 1, 64, 32>}, {pipeline_mode = #tpu.pipeline_mode<synchronous>, transform_indices = @transform_1, window_bounds = array<i64: 32, 64>}, {transform_indices = @transform_2, window_bounds = array<i64: 1, 64, 64>}]} {
    %c0 = arith.constant 0 : index
    %c0_0 = arith.constant 0 : index
    %c0_1 = arith.constant 0 : index
    %0 = vector.load %arg2[%c0, %c0_0, %c0_1] : memref<1x64x32xf32, #tpu.memory_space<vmem>>, vector<1x64x32xf32>
    %1 = vector.shape_cast %0 : vector<1x64x32xf32> to vector<64x32xf32>
    %c0_2 = arith.constant 0 : index
    %c0_3 = arith.constant 0 : index
    %2 = vector.load %arg3[%c0_2, %c0_3] : memref<32x64xf32, #tpu.memory_space<vmem>>, vector<32x64xf32>
    %cst = arith.constant dense<0.000000e+00> : vector<64x64xf32>
    %3 = tpu.matmul %1, %2, %cst {dimension_numbers = #tpu.dot_dimension_numbers<[1], [0], [0], [1], [0, 0, 1, 1], [], []>} : vector<64x32xf32>, vector<32x64xf32>, vector<64x64xf32> -> vector<64x64xf32>
    %c0_4 = arith.constant 0 : index
    %c0_5 = arith.constant 0 : index
    %c0_6 = arith.constant 0 : index
    %4 = vector.load %arg4[%c0_4, %c0_5, %c0_6] : memref<1x64x64xf32, #tpu.memory_space<vmem>>, vector<1x64x64xf32>
    %5 = vector.shape_cast %4 : vector<1x64x64xf32> to vector<64x64xf32>
    %6 = vector.shape_cast %3 : vector<64x64xf32> to vector<1x64x64xf32>
    tpu.vector_store %arg4[%c0_4, %c0_5, %c0_6], %6 {strides = array<i32>} : memref<1x64x64xf32, #tpu.memory_space<vmem>>, vector<1x64x64xf32>,
    return
  }
  func.func @transform_0(%arg0: i32, %arg1: i32) -> (i32, i32, i32) {
    %c0_i32 = arith.constant 0 : i32
    %c0_i32_0 = arith.constant 0 : i32
    return %arg0, %arg1, %c0_i32 : i32, i32, i32
  }
  func.func @transform_1(%arg0: i32, %arg1: i32) -> (i32, i32) {
    %c0_i32 = arith.constant 0 : i32
    %c0_i32_0 = arith.constant 0 : i32
    %c0_i32_1 = arith.constant 0 : i32
    return %c0_i32, %c0_i32_0 : i32, i32
  }
  func.func @transform_2(%arg0: i32, %arg1: i32) -> (i32, i32, i32) {
    %c0_i32 = arith.constant 0 : i32
    %c0_i32_0 = arith.constant 0 : i32
    return %arg0, %arg1, %c0_i32 : i32, i32, i32
  }
}

module attributes {stable_mosaic.version = 11 : i64} {
  func.func @_attention_kernel(%arg0: i32, %arg1: i32, %arg2: memref<1x64x32xf32, #tpu.memory_space<vmem>>, %arg3: memref<1x64x64xf32, #tpu.memory_space<vmem>>, %arg4: memref<32x32xf32, #tpu.memory_space<vmem>>, %arg5: memref<32x32xf32, #tpu.memory_space<vmem>>, %arg6: memref<1x32xf32, #tpu.memory_space<vmem>>, %arg7: memref<1x64x32xf32, #tpu.memory_space<vmem>>) attributes {dimension_semantics = [#tpu.dimension_semantics<parallel>, #tpu.dimension_semantics<parallel>], iteration_bounds = array<i64: 2, 1>, scalar_prefetch = 0 : i64, scratch_operands = 0 : i64, tpu.core_type = #tpu.core_type<tc>, window_params = [{transform_indices = @transform_0, window_bounds = array<i64: 1, 64, 32>}, {transform_indices = @transform_1, window_bounds = array<i64: 1, 64, 64>}, {pipeline_mode = #tpu.pipeline_mode<synchronous>, transform_indices = @transform_2, window_bounds = array<i64: 32, 32>}, {pipeline_mode = #tpu.pipeline_mode<synchronous>, transform_indices = @transform_3, window_bounds = array<i64: 32, 32>}, {pipeline_mode = #tpu.pipeline_mode<synchronous>, transform_indices = @transform_4, window_bounds = array<i64: 1, 32>}, {transform_indices = @transform_5, window_bounds = array<i64: 1, 64, 32>}]} {
    %c0 = arith.constant 0 : index
    %c0_0 = arith.constant 0 : index
    %c0_1 = arith.constant 0 : index
    %0 = vector.load %arg2[%c0, %c0_0, %c0_1] : memref<1x64x32xf32, #tpu.memory_space<vmem>>, vector<1x64x32xf32>
    %1 = vector.shape_cast %0 : vector<1x64x32xf32> to vector<64x32xf32>
    %c0_2 = arith.constant 0 : index
    %c0_3 = arith.constant 0 : index
    %c0_4 = arith.constant 0 : index
    %2 = vector.load %arg3[%c0_2, %c0_3, %c0_4] : memref<1x64x64xf32, #tpu.memory_space<vmem>>, vector<1x64x64xf32>
    %3 = vector.shape_cast %2 : vector<1x64x64xf32> to vector<64x64xf32>
    %c0_5 = arith.constant 0 : index
    %c0_6 = arith.constant 0 : index
    %4 = vector.load %arg4[%c0_5, %c0_6] : memref<32x32xf32, #tpu.memory_space<vmem>>, vector<32x32xf32>
    %cst = arith.constant dense<0.000000e+00> : vector<64x32xf32>
    %5 = tpu.matmul %1, %4, %cst {dimension_numbers = #tpu.dot_dimension_numbers<[1], [0], [0], [1], [0, 0, 1, 1], [], []>} : vector<64x32xf32>, vector<32x32xf32>, vector<64x32xf32> -> vector<64x32xf32>
    %cst_7 = arith.constant 0.353553385 : f32
    %6 = vector.broadcast %cst_7 : f32 to vector<64x32xf32>
    %7 = arith.mulf %5, %6 : vector<64x32xf32>
    %8 = vector.extract_strided_slice %7 {offsets = [0, 0], sizes = [64, 8], strides = [1, 1]} : vector<64x32xf32> to vector<64x8xf32>
    %9 = vector.extract_strided_slice %3 {offsets = [0, 0], sizes = [64, 8], strides = [1, 1]} : vector<64x64xf32> to vector<64x8xf32>
    %10 = vector.extract_strided_slice %3 {offsets = [0, 32], sizes = [64, 8], strides = [1, 1]} : vector<64x64xf32> to vector<64x8xf32>
    %cst_8 = arith.constant dense<0.000000e+00> : vector<64x64xf32>
    %11 = tpu.matmul %8, %9, %cst_8 {dimension_numbers = #tpu.dot_dimension_numbers<[1], [1], [0], [0], [0, 0, 1, 0], [], []>} : vector<64x8xf32>, vector<64x8xf32>, vector<64x64xf32> -> vector<64x64xf32>
    %cst_9 = arith.constant dense<0xFF800000> : vector<64xf32>
    %12 = vector.multi_reduction <maximumf>, %11, %cst_9 [1] : vector<64x64xf32> to vector<64xf32>
    %13 = vector.shape_cast %12 : vector<64xf32> to vector<64x1xf32>
    %14 = vector.broadcast %13 : vector<64x1xf32> to vector<64x64xf32>
    %15 = arith.subf %11, %14 : vector<64x64xf32>
    %16 = math.exp %15 : vector<64x64xf32>
    %cst_10 = arith.constant dense<0.000000e+00> : vector<64xf32>
    %17 = vector.multi_reduction <add>, %16, %cst_10 [1] : vector<64x64xf32> to vector<64xf32>
    %18 = vector.shape_cast %17 : vector<64xf32> to vector<64x1xf32>
    %19 = tpu.reciprocal %18 {approx = true} : vector<64x1xf32> -> vector<64x1xf32>
    %cst_11 = arith.constant dense<0.000000e+00> : vector<64x8xf32>
    %20 = tpu.matmul %16, %10, %cst_11 {dimension_numbers = #tpu.dot_dimension_numbers<[1], [0], [0], [1], [0, 0, 1, 1], [], []>} : vector<64x64xf32>, vector<64x8xf32>, vector<64x8xf32> -> vector<64x8xf32>
    %21 = vector.broadcast %19 : vector<64x1xf32> to vector<64x8xf32>
    %22 = arith.mulf %20, %21 : vector<64x8xf32>
    %23 = vector.extract_strided_slice %7 {offsets = [0, 8], sizes = [64, 8], strides = [1, 1]} : vector<64x32xf32> to vector<64x8xf32>
    %24 = vector.extract_strided_slice %3 {offsets = [0, 8], sizes = [64, 8], strides = [1, 1]} : vector<64x64xf32> to vector<64x8xf32>
    %25 = vector.extract_strided_slice %3 {offsets = [0, 40], sizes = [64, 8], strides = [1, 1]} : vector<64x64xf32> to vector<64x8xf32>
    %cst_12 = arith.constant dense<0.000000e+00> : vector<64x64xf32>
    %26 = tpu.matmul %23, %24, %cst_12 {dimension_numbers = #tpu.dot_dimension_numbers<[1], [1], [0], [0], [0, 0, 1, 0], [], []>} : vector<64x8xf32>, vector<64x8xf32>, vector<64x64xf32> -> vector<64x64xf32>
    %cst_13 = arith.constant dense<0xFF800000> : vector<64xf32>
    %27 = vector.multi_reduction <maximumf>, %26, %cst_13 [1] : vector<64x64xf32> to vector<64xf32>
    %28 = vector.shape_cast %27 : vector<64xf32> to vector<64x1xf32>
    %29 = vector.broadcast %28 : vector<64x1xf32> to vector<64x64xf32>
    %30 = arith.subf %26, %29 : vector<64x64xf32>
    %31 = math.exp %30 : vector<64x64xf32>
    %cst_14 = arith.constant dense<0.000000e+00> : vector<64xf32>
    %32 = vector.multi_reduction <add>, %31, %cst_14 [1] : vector<64x64xf32> to vector<64xf32>
    %33 = vector.shape_cast %32 : vector<64xf32> to vector<64x1xf32>
    %34 = tpu.reciprocal %33 {approx = true} : vector<64x1xf32> -> vector<64x1xf32>
    %cst_15 = arith.constant dense<0.000000e+00> : vector<64x8xf32>
    %35 = tpu.matmul %31, %25, %cst_15 {dimension_numbers = #tpu.dot_dimension_numbers<[1], [0], [0], [1], [0, 0, 1, 1], [], []>} : vector<64x64xf32>, vector<64x8xf32>, vector<64x8xf32> -> vector<64x8xf32>
    %36 = vector.broadcast %34 : vector<64x1xf32> to vector<64x8xf32>
    %37 = arith.mulf %35, %36 : vector<64x8xf32>
    %38 = vector.extract_strided_slice %7 {offsets = [0, 16], sizes = [64, 8], strides = [1, 1]} : vector<64x32xf32> to vector<64x8xf32>
    %39 = vector.extract_strided_slice %3 {offsets = [0, 16], sizes = [64, 8], strides = [1, 1]} : vector<64x64xf32> to vector<64x8xf32>
    %40 = vector.extract_strided_slice %3 {offsets = [0, 48], sizes = [64, 8], strides = [1, 1]} : vector<64x64xf32> to vector<64x8xf32>
    %cst_16 = arith.constant dense<0.000000e+00> : vector<64x64xf32>
    %41 = tpu.matmul %38, %39, %cst_16 {dimension_numbers = #tpu.dot_dimension_numbers<[1], [1], [0], [0], [0, 0, 1, 0], [], []>} : vector<64x8xf32>, vector<64x8xf32>, vector<64x64xf32> -> vector<64x64xf32>
    %cst_17 = arith.constant dense<0xFF800000> : vector<64xf32>
    %42 = vector.multi_reduction <maximumf>, %41, %cst_17 [1] : vector<64x64xf32> to vector<64xf32>
    %43 = vector.shape_cast %42 : vector<64xf32> to vector<64x1xf32>
    %44 = vector.broadcast %43 : vector<64x1xf32> to vector<64x64xf32>
    %45 = arith.subf %41, %44 : vector<64x64xf32>
    %46 = math.exp %45 : vector<64x64xf32>
    %cst_18 = arith.constant dense<0.000000e+00> : vector<64xf32>
    %47 = vector.multi_reduction <add>, %46, %cst_18 [1] : vector<64x64xf32> to vector<64xf32>
    %48 = vector.shape_cast %47 : vector<64xf32> to vector<64x1xf32>
    %49 = tpu.reciprocal %48 {approx = true} : vector<64x1xf32> -> vector<64x1xf32>
    %cst_19 = arith.constant dense<0.000000e+00> : vector<64x8xf32>
    %50 = tpu.matmul %46, %40, %cst_19 {dimension_numbers = #tpu.dot_dimension_numbers<[1], [0], [0], [1], [0, 0, 1, 1], [], []>} : vector<64x64xf32>, vector<64x8xf32>, vector<64x8xf32> -> vector<64x8xf32>
    %51 = vector.broadcast %49 : vector<64x1xf32> to vector<64x8xf32>
    %52 = arith.mulf %50, %51 : vector<64x8xf32>
    %53 = vector.extract_strided_slice %7 {offsets = [0, 24], sizes = [64, 8], strides = [1, 1]} : vector<64x32xf32> to vector<64x8xf32>
    %54 = vector.extract_strided_slice %3 {offsets = [0, 24], sizes = [64, 8], strides = [1, 1]} : vector<64x64xf32> to vector<64x8xf32>
    %55 = vector.extract_strided_slice %3 {offsets = [0, 56], sizes = [64, 8], strides = [1, 1]} : vector<64x64xf32> to vector<64x8xf32>
    %cst_20 = arith.constant dense<0.000000e+00> : vector<64x64xf32>
    %56 = tpu.matmul %53, %54, %cst_20 {dimension_numbers = #tpu.dot_dimension_numbers<[1], [1], [0], [0], [0, 0, 1, 0], [], []>} : vector<64x8xf32>, vector<64x8xf32>, vector<64x64xf32> -> vector<64x64xf32>
    %cst_21 = arith.constant dense<0xFF800000> : vector<64xf32>
    %57 = vector.multi_reduction <maximumf>, %56, %cst_21 [1] : vector<64x64xf32> to vector<64xf32>
    %58 = vector.shape_cast %57 : vector<64xf32> to vector<64x1xf32>
    %59 = vector.broadcast %58 : vector<64x1xf32> to vector<64x64xf32>
    %60 = arith.subf %56, %59 : vector<64x64xf32>
    %61 = math.exp %60 : vector<64x64xf32>
    %cst_22 = arith.constant dense<0.000000e+00> : vector<64xf32>
    %62 = vector.multi_reduction <add>, %61, %cst_22 [1] : vector<64x64xf32> to vector<64xf32>
    %63 = vector.shape_cast %62 : vector<64xf32> to vector<64x1xf32>
    %64 = tpu.reciprocal %63 {approx = true} : vector<64x1xf32> -> vector<64x1xf32>
    %cst_23 = arith.constant dense<0.000000e+00> : vector<64x8xf32>
    %65 = tpu.matmul %61, %55, %cst_23 {dimension_numbers = #tpu.dot_dimension_numbers<[1], [0], [0], [1], [0, 0, 1, 1], [], []>} : vector<64x64xf32>, vector<64x8xf32>, vector<64x8xf32> -> vector<64x8xf32>
    %66 = vector.broadcast %64 : vector<64x1xf32> to vector<64x8xf32>
    %67 = arith.mulf %65, %66 : vector<64x8xf32>
    %68 = tpu.concatenate %22, %37, %52, %67 in 1 : vector<64x8xf32>, vector<64x8xf32>, vector<64x8xf32>, vector<64x8xf32> -> vector<64x32xf32>
    %c0_24 = arith.constant 0 : index
    %c0_25 = arith.constant 0 : index
    %69 = vector.load %arg5[%c0_24, %c0_25] : memref<32x32xf32, #tpu.memory_space<vmem>>, vector<32x32xf32>
    %cst_26 = arith.constant dense<0.000000e+00> : vector<64x32xf32>
    %70 = tpu.matmul %68, %69, %cst_26 {dimension_numbers = #tpu.dot_dimension_numbers<[1], [0], [0], [1], [0, 0, 1, 1], [], []>} : vector<64x32xf32>, vector<32x32xf32>, vector<64x32xf32> -> vector<64x32xf32>
    %c0_27 = arith.constant 0 : index
    %c0_28 = arith.constant 0 : index
    %71 = vector.load %arg6[%c0_27, %c0_28] : memref<1x32xf32, #tpu.memory_space<vmem>>, vector<1x32xf32>
    %72 = vector.broadcast %71 : vector<1x32xf32> to vector<64x32xf32>
    %73 = arith.addf %70, %72 : vector<64x32xf32>
    %c0_29 = arith.constant 0 : index
    %c0_30 = arith.constant 0 : index
    %c0_31 = arith.constant 0 : index
    %74 = vector.load %arg7[%c0_29, %c0_30, %c0_31] : memref<1x64x32xf32, #tpu.memory_space<vmem>>, vector<1x64x32xf32>
    %75 = vector.shape_cast %74 : vector<1x64x32xf32> to vector<64x32xf32>
    %76 = vector.shape_cast %73 : vector<64x32xf32> to vector<1x64x32xf32>
    tpu.vector_store %arg7[%c0_29, %c0_30, %c0_31], %76 {strides = array<i32>} : memref<1x64x32xf32, #tpu.memory_space<vmem>>, vector<1x64x32xf32>,
    return
  }
  func.func @transform_0(%arg0: i32, %arg1: i32) -> (i32, i32, i32) {
    %c0_i32 = arith.constant 0 : i32
    %c0_i32_0 = arith.constant 0 : i32
    return %arg0, %arg1, %c0_i32 : i32, i32, i32
  }
  func.func @transform_1(%arg0: i32, %arg1: i32) -> (i32, i32, i32) {
    %c0_i32 = arith.constant 0 : i32
    %c0_i32_0 = arith.constant 0 : i32
    %c0_i32_1 = arith.constant 0 : i32
    return %arg0, %c0_i32, %c0_i32_0 : i32, i32, i32
  }
  func.func @transform_2(%arg0: i32, %arg1: i32) -> (i32, i32) {
    %c0_i32 = arith.constant 0 : i32
    %c0_i32_0 = arith.constant 0 : i32
    %c0_i32_1 = arith.constant 0 : i32
    return %c0_i32, %c0_i32_0 : i32, i32
  }
  func.func @transform_3(%arg0: i32, %arg1: i32) -> (i32, i32) {
    %c0_i32 = arith.constant 0 : i32
    %c0_i32_0 = arith.constant 0 : i32
    %c0_i32_1 = arith.constant 0 : i32
    return %c0_i32, %c0_i32_0 : i32, i32
  }
  func.func @transform_4(%arg0: i32, %arg1: i32) -> (i32, i32) {
    %c0_i32 = arith.constant 0 : i32
    %c0_i32_0 = arith.constant 0 : i32
    %c0_i32_1 = arith.constant 0 : i32
    return %c0_i32, %c0_i32_0 : i32, i32
  }
  func.func @transform_5(%arg0: i32, %arg1: i32) -> (i32, i32, i32) {
    %c0_i32 = arith.constant 0 : i32
    %c0_i32_0 = arith.constant 0 : i32
    return %arg0, %arg1, %c0_i32 : i32, i32, i32
  }
}

</mosaic_0001>

<bundles_post_ra>
// kernel: _attention_forward.2
= control target key start
LH: loop header
LB: loop body
LE: loop exit
PB: predicated region body
PF: predicated region fallthrough
CT: control target
= control target key end

     0   :  { %s453_s9 = smov 0   ;;  %s455_s10 = smov 0   ;;  %s521_s0 = inlined_call_operand.vmem [shape: f32[2,64,32], index: 0, kind: input, shape index: {}]   ;;  %s522_s1 = inlined_call_operand.vmem [shape: f32[32,64], index: 1, kind: input, shape index: {}]   ;;  %s523_s2 = inlined_call_operand.vmem [shape: f32[2,64,64], index: 2, kind: output, shape index: {}]  }
   0x1   :  { %s457_s11 = smov 0  }
   0x2 LB: > { %s24_s12 = sadd.s32 1, %s432_s10  ;;  %p361_p0 = scmp.ge.s32.totalorder %s436_s11, 1  ;;  %s436_s11 = sphi %s457_s11, %s12_s11   ;;  %s432_s10 = sphi %s455_s10, %s525_s10   ;;  %s428_s9 = sphi %s453_s9, %s524_s9  }
   0x3   : > { %p26_p1 = scmp.ge.s32.totalorder %s24_s12, 2  ;;  %p133_p2 = scmp.lt.s32.totalorder %s436_s11, 3 }
   0x5   : > { %s527_s12 = smov (%p26_p1, %s24_s12), 0  ;;  %p134_p3 = pnand %p361_p0, %p133_p2 }
   0x6   : > { %p164_p4 = scmp.lt.s32.totalorder (!%p134_p3), %s428_s9, 1 }
   0x7   : > { %137 = sbr.rel (%p134_p3) target bundleno = 162 (0xa2), region = 28 }
   0xc   : > { %v194_v0 = vld [vmem:[%s522_s1 + $0x18] sm:$0xff]  ;;  %v193_v1 = vld [vmem:[%s522_s1 + $0x10] sm:$0xff]  ;;  %v192_v2 = vld [vmem:[%s522_s1 + $0x8] sm:$0xff]  ;;  %s529_s9 = smov (!%p164_p4, %s428_s9), 1  ;;  %vm195_vm0 = vcmask 261120   ;;  %vm261_vm1 = vcmask 523264  }
   0xd   : > { %379 = vmatpush.msra.mxu2 %v194_v0  ;;  %380 = vmatpush.msra.mxu3 %v194_v0  ;;  %v191_v3 = vld [vmem:[%s522_s1] sm:$0xff]  ;;  %s376_s21 = sshll.u32 %s529_s9, 6 }
   0xe   : > { %232 = vmatpush.msra.mxu0 %v194_v0  ;;  %378 = vmatpush.msra.mxu1 %v194_v0  ;;  %s171_s24 = scalar_lea.vmem %s521_s0, %s376_s21  ;;  %s181_s27 = scalar_lea.vmem %s523_s2, %s376_s21 }
   0xf   : > { %382 = vmatpush.msra.mxu2 %v193_v1  ;;  %383 = vmatpush.msra.mxu3 %v193_v1  ;;  %v187_v4 = vld [vmem:[%s171_s24 + $0x20] sm:$0xff]  ;;  %v189_v5 = vld [vmem:[%s171_s24 + $0x30] sm:$0xff]  ;;  %v188_v8 = vld [vmem:[%s171_s24 + $0x28] sm:$0xff] }
  0x10   : > { %233 = vmatpush.msra.mxu0 %v193_v1  ;;  %381 = vmatpush.msra.mxu1 %v193_v1  ;;  %v183_v6 = vld [vmem:[%s171_s24] sm:$0xff]  ;;  %v185_v7 = vld [vmem:[%s171_s24 + $0x10] sm:$0xff]  ;;  %v190_v9 = vld [vmem:[%s171_s24 + $0x38] sm:$0xff] }
  0x11   : > { %385 = vmatpush.msra.mxu2 %v192_v2  ;;  %386 = vmatpush.msra.mxu3 %v192_v2  ;;  %v184_v10 = vld [vmem:[%s171_s24 + $0x8] sm:$0xff]  ;;  %v186_v11 = vld [vmem:[%s171_s24 + $0x18] sm:$0xff] }
  0x12   : > { %234 = vmatpush.msra.mxu0 %v192_v2  ;;  %384 = vmatpush.msra.mxu1 %v192_v2 }
  0x13   : > { %388 = vmatpush.msra.mxu2 %v191_v3  ;;  %389 = vmatpush.msra.mxu3 %v191_v3 }
  0x14   : > { %370 = vmatmul.msk.f32.vlgmr.msra.gmra.mxu2 %vm195_vm0, %v187_v4  ;;  %372 = vmatmul.msk.f32.vlgmr.msra.gmra.mxu3 %vm195_vm0, %v189_v5 }
  0x15   : > { %235 = vmatpush.msra.mxu0 %v191_v3  ;;  %387 = vmatpush.msra.mxu1 %v191_v3 }
  0x16   : > { %366 = vmatmul.msk.f32.vlgmr.msra.gmra.mxu0 %vm195_vm0, %v183_v6  ;;  %368 = vmatmul.msk.f32.vlgmr.msra.gmra.mxu1 %vm195_vm0, %v185_v7 }
  0x1c   : > { %371 = vmatmul.msk.f32.gmra.mxu2 %vm195_vm0, %v188_v8  ;;  %373 = vmatmul.msk.f32.gmra.mxu3 %vm195_vm0, %v190_v9 }
  0x1e   : > { %367 = vmatmul.msk.f32.gmra.mxu0 %vm195_vm0, %v184_v10  ;;  %369 = vmatmul.msk.f32.gmra.mxu1 %vm195_vm0, %v186_v11 }
  0x93   : > { %v237_v12 = vpop.f32.mrf.mxu0  ;;  %v243_v13 = vpop.f32.mrf.mxu1 }
  0x94   : > { %262 = vst.msk [vmem:[%s181_s27] sm:$0xff] %vm261_vm1, %v237_v12 }
  0x95   : > { %264 = vst.msk [vmem:[%s181_s27 + $0x10] sm:$0xff] %vm261_vm1, %v243_v13 }
  0x97   : > { %v249_v14 = vpop.f32.mrf.mxu2  ;;  %v255_v15 = vpop.f32.mrf.mxu3 }
  0x98   : > { %266 = vst.msk [vmem:[%s181_s27 + $0x20] sm:$0xff] %vm261_vm1, %v249_v14 }
  0x99   : > { %268 = vst.msk [vmem:[%s181_s27 + $0x30] sm:$0xff] %vm261_vm1, %v255_v15 }
  0x9b   : > { %v240_v16 = vpop.f32.mrf.mxu0  ;;  %v246_v17 = vpop.f32.mrf.mxu1 }
  0x9c   : > { %263 = vst.msk [vmem:[%s181_s27 + $0x8] sm:$0xff] %vm261_vm1, %v240_v16 }
  0x9d   : > { %265 = vst.msk [vmem:[%s181_s27 + $0x18] sm:$0xff] %vm261_vm1, %v246_v17 }
  0x9f   : > { %v252_v18 = vpop.f32.mrf.mxu2  ;;  %v258_v19 = vpop.f32.mrf.mxu3 }
  0xa0   : > { %267 = vst.msk [vmem:[%s181_s27 + $0x28] sm:$0xff] %vm261_vm1, %v252_v18 }
  0xa1   : > { %269 = vst.msk [vmem:[%s181_s27 + $0x38] sm:$0xff] %vm261_vm1, %v258_v19 }
  0xa2 PF: > { %s12_s11 = sadd.s32 1, %s436_s11   ;;  %s524_s9 = smov %s432_s10 }
  0xa3   : > { %p9_p5 = scmp.ge.s32.totalorder %s12_s11, 4   ;;  %s525_s10 = smov %s527_s12 }
  0xa5   :  { %11 = sbr.rel (!%p9_p5) target bundleno = 2 (0x2), region = 58 }

// kernel: _attention_forward.3
= control target key start
LH: loop header
LB: loop body
LE: loop exit
PB: predicated region body
PF: predicated region fallthrough
CT: control target
= control target key end

     0   :  { %s2249_s18 = smov 0   ;;  %s2251_s19 = smov 0   ;;  %s2909_s0 = inlined_call_operand.vmem [shape: f32[2,64,32], index: 0, kind: input, shape index: {}]   ;;  %s2910_s1 = inlined_call_operand.vmem [shape: f32[2,64,64], index: 1, kind: input, shape index: {}]   ;;  %s2911_s2 = inlined_call_operand.vmem [shape: f32[32,32], index: 2, kind: input, shape index: {}]   ;;  %s2912_s3 = inlined_call_operand.vmem [shape: f32[32,32], index: 3, kind: input, shape index: {}]   ;;  %s2913_s4 = inlined_call_operand.vmem [shape: f32[1,32], index: 4, kind: input, shape index: {}]   ;;  %s2914_s5 = inlined_call_operand.vmem [shape: f32[2,64,32], index: 5, kind: output, shape index: {}]  }
   0x1   :  { %s2253_s20 = smov 0  }
   0x2 LB: > { %s27_s21 = sadd.s32 1, %s2203_s19  ;;  %p1798_p0 = scmp.ge.s32.totalorder %s2207_s20, 1  ;;  %s2207_s20 = sphi %s2253_s20, %s15_s20   ;;  %s2203_s19 = sphi %s2251_s19, %s2916_s19   ;;  %s2199_s18 = sphi %s2249_s18, %s2915_s18  }
   0x3   : > { %p29_p1 = scmp.ge.s32.totalorder %s27_s21, 2  ;;  %p218_p2 = scmp.lt.s32.totalorder %s2207_s20, 3 }
   0x5   : > { %s2918_s21 = smov (%p29_p1, %s27_s21), 0  ;;  %p219_p3 = pnand %p1798_p0, %p218_p2 }
   0x6   : > { %p260_p4 = scmp.lt.s32.totalorder (!%p219_p3), %s2199_s18, 1  ;;  %s2209_s12 = smov (!%p219_p3), 120  }
   0x7   : > { %222 = sbr.rel (%p219_p3) target bundleno = 1254 (0x4e6), region = 40  ;;  %s2210_s13 = smov (!%p219_p3), 96  }
   0x8   : > { %s2211_s14 = smov (!%p219_p3), 112   ;;  %s2212_s15 = smov (!%p219_p3), 104  }
   0x9   : > { %s2213_s16 = smov (!%p219_p3), 88   ;;  %s2214_s17 = smov (!%p219_p3), 80  }
   0xa   : > { %s2216_s22 = smov (!%p219_p3), 8   ;;  %s2217_s23 = smov (!%p219_p3), 24  }
   0xb   : > { %s2218_s24 = smov (!%p219_p3), 16  }
   0xc   : > { %v303_v0 = vld [vmem:[%s2911_s2 + $0x18] sm:$0xff]  ;;  %v302_v1 = vld [vmem:[%s2911_s2 + $0x10] sm:$0xff]  ;;  %v301_v2 = vld [vmem:[%s2911_s2 + $0x8] sm:$0xff]  ;;  %s2920_s18 = smov (!%p260_p4, %s2199_s18), 1  ;;  %vm304_vm0 = vcmask 261120   ;;  %vm378_vm1 = vcmask 64512  }
   0xd   : > { %341 = vmatpush.msra.mxu0 %v303_v0  ;;  %1922 = vmatpush.msra.mxu3 %v303_v0  ;;  %v300_v3 = vld [vmem:[%s2911_s2] sm:$0xff]  ;;  %s2279_s30 = sshll.u32 %s2920_s18, 6  ;;  %vm468_vm2 = vcmask 523264   ;;  %s2215_s18 = smov 72   ;;  %vm1596_vm3 = vcmask 130048   ;;  %vm1605_vm4 = vcmask 195584  }
   0xe   : > { %s2285_s8 = scalar_lea.vmem %s2910_s1, %s2279_s30  ;;  %s2291_s11 = scalar_lea.vmem %s2909_s0, %s2279_s30 }
   0xf   : > { %342 = vmatpush.msra.mxu0 %v302_v1  ;;  %1923 = vmatpush.msra.mxu3 %v302_v1  ;;  %v297_v4 = vld [vmem:[%s2285_s8 + $0x28] sm:$0xff]  ;;  %v284_v5 = vld [vmem:[%s2291_s11] sm:$0xff]  ;;  %v286_v6 = vld [vmem:[%s2291_s11 + $0x10] sm:$0xff] }
  0x10   : > { %672 = vrot.lane.b32.xlu1 %v297_v4, %s2209_s12  ;;  %v299_v7 = vld [vmem:[%s2285_s8 + $0x38] sm:$0xff]  ;;  %v296_v8 = vld [vmem:[%s2285_s8 + $0x20] sm:$0xff]  ;;  %v285_v9 = vld [vmem:[%s2291_s11 + $0x8] sm:$0xff] }
  0x11   : > { %343 = vmatpush.msra.mxu0 %v301_v2  ;;  %1924 = vmatpush.msra.mxu3 %v301_v2  ;;  %v287_v10 = vld [vmem:[%s2291_s11 + $0x18] sm:$0xff]  ;;  %v298_v11 = vld [vmem:[%s2285_s8 + $0x30] sm:$0xff]  ;;  %v292_v12 = vld [vmem:[%s2285_s8] sm:$0xff]  ;;  %v2323_v18 = vpack.i.bf16 %v296_v8, %v297_v4 }
  0x12   : > { %676 = vrot.lane.b32.xlu0 %v299_v7, %s2209_s12  ;;  %v288_v13 = vld [vmem:[%s2291_s11 + $0x20] sm:$0xff]  ;;  %v293_v14 = vld [vmem:[%s2285_s8 + $0x8] sm:$0xff]  ;;  %v2315_v15 = vpack.i.bf16 %v298_v11, %v299_v7  ;;  %v295_v17 = vld [vmem:[%s2285_s8 + $0x18] sm:$0xff]  ;;  %1813 = vmatpush.xpose.msk.msra.mxu1 %vm378_vm1, %v299_v7 }
  0x13   : > { %344 = vmatpush.msra.mxu0 %v300_v3  ;;  %1925 = vmatpush.msra.mxu3 %v300_v3  ;;  %v289_v16 = vld [vmem:[%s2291_s11 + $0x28] sm:$0xff]  ;;  %v290_v19 = vld [vmem:[%s2291_s11 + $0x30] sm:$0xff]  ;;  %v2330_v21 = vpack.i.bf16 %v292_v12, %v293_v14  ;;  %v291_v23 = vld [vmem:[%s2291_s11 + $0x38] sm:$0xff] }
  0x14   : > { %1805 = vmatmul.msk.f32.vlgmr.msra.gmra.mxu0 %vm304_vm0, %v284_v5  ;;  %1807 = vmatmul.msk.f32.vlgmr.msra.gmra.mxu3 %vm304_vm0, %v286_v6  ;;  %v294_v20 = vld [vmem:[%s2285_s8 + $0x10] sm:$0xff] }
  0x15   : > { %668 = vrot.lane.b32.xlu2 %v295_v17, %s2209_s12  ;;  %v2333_v22 = vpack.i.bf16 %v294_v20, %v295_v17 }
  0x16   : > { %1814 = vmatpush.xpose.msk.msra.mxu1 %vm378_vm1, %v298_v11 }
  0x18   : > { %670 = vrot.lane.b32.xlu1 %v296_v8, %s2209_s12 }
  0x1a   : > { %674 = vrot.lane.b32.xlu0 %v298_v11, %s2209_s12  ;;  %1815 = vmatpush.xpose.msk.msra.mxu1 %vm378_vm1, %v297_v4 }
  0x1c   : > { %1806 = vmatmul.msk.f32.gmra.mxu0 %vm304_vm0, %v285_v9  ;;  %1808 = vmatmul.msk.f32.gmra.mxu3 %vm304_vm0, %v287_v10 }
  0x1d   : > { %666 = vrot.lane.b32.xlu2 %v294_v20, %s2209_s12 }
  0x1e   : > { %1816 = vmatpush.xpose.msk.msra.mxu1 %vm378_vm1, %v296_v8 }
  0x20   : > { %662 = vrot.lane.b32.xlu1 %v292_v12, %s2209_s12 }
  0x22   : > { %664 = vrot.lane.b32.xlu0 %v293_v14, %s2209_s12  ;;  %1817 = vmatpush.xpose.msk.msra.mxu1 %vm378_vm1, %v295_v17 }
  0x24   : > { %1809 = vmatmul.msk.f32.gmra.mxu3 %vm304_vm0, %v288_v13 }
  0x25   : > { %1987 = vrot.lane.b32.xlu2 %v2333_v22, %s2210_s13 }
  0x26   : > { %1818 = vmatpush.xpose.msk.msra.mxu1 %vm378_vm1, %v294_v20 }
  0x28   : > { %1977 = vrot.lane.b32.xlu1 %v2315_v15, %s2210_s13 }
  0x2a   : > { %944 = vrot.lane.b32.xlu0 %v292_v12, %s2211_s14  ;;  %1819 = vmatpush.xpose.msk.msra.mxu1 %vm378_vm1, %v293_v14 }
  0x2c   : > { %1810 = vmatmul.msk.f32.gmra.mxu3 %vm304_vm0, %v289_v16 }
  0x2d   : > { %1238 = vrot.lane.b32.xlu2 %v298_v11, %s2212_s15 }
  0x2e   : > { %1820 = vmatpush.xpose.msk.msra.mxu1 %vm378_vm1, %v292_v12 }
  0x30   : > { %1982 = vrot.lane.b32.xlu1 %v2323_v18, %s2210_s13 }
  0x34   : > { %1811 = vmatmul.msk.f32.gmra.mxu3 %vm304_vm0, %v290_v19 }
  0x35   : > { %1234 = vrot.lane.b32.xlu2 %v296_v8, %s2212_s15 }
  0x38   : > { %1992 = vrot.lane.b32.xlu1 %v2330_v21, %s2210_s13  ;;  %s282_s13 = scalar_lea.vmem %s2914_s5, %s2279_s30 }
  0x3c   : > { %1812 = vmatmul.msk.f32.gmra.mxu3 %vm304_vm0, %v291_v23 }
  0x3d   : > { %950 = vrot.lane.b32.xlu2 %v295_v17, %s2211_s14 }
  0x40   : > { %958 = vrot.lane.b32.xlu1 %v299_v7, %s2211_s14 }
  0x45   : > { %948 = vrot.lane.b32.xlu2 %v294_v20, %s2211_s14 }
  0x48   : > { %1240 = vrot.lane.b32.xlu1 %v299_v7, %s2212_s15 }
  0x4d   : > { %1228 = vrot.lane.b32.xlu2 %v293_v14, %s2212_s15 }
  0x50   : > { %956 = vrot.lane.b32.xlu1 %v298_v11, %s2211_s14 }
  0x58   : > { %954 = vrot.lane.b32.xlu1 %v297_v4, %s2211_s14 }
  0x60   : > { %1236 = vrot.lane.b32.xlu1 %v297_v4, %s2212_s15 }
  0x68   : > { %952 = vrot.lane.b32.xlu1 %v296_v8, %s2211_s14 }
  0x6f   : > { %v669_v30 = vpop.permute.xlu2 %668 }
  0x70   : > { %1232 = vrot.lane.b32.xlu1 %v295_v17, %s2212_s15 }
  0x77   : > { %v667_v37 = vpop.permute.xlu2 %666 }
  0x78   : > { %1230 = vrot.lane.b32.xlu1 %v294_v20, %s2212_s15 }
  0x7f   : > { %v1988_v48 = vpop.permute.xlu2 %1987 }
  0x80   : > { %946 = vrot.lane.b32.xlu1 %v293_v14, %s2211_s14  ;;  %v1989_v49 = vunpack.i.l.bf16 %v1988_v48  ;;  %v1990_v50 = vunpack.i.h.bf16 %v1988_v48 }
  0x82   : > { %v673_v24 = vpop.permute.xlu1 %672 }
  0x84   : > { %v677_v25 = vpop.permute.xlu0 %676 }
  0x85   : > { %1837 = vmatpush.xpose.msk.msrb.mxu3 %vm378_vm1, %v677_v25 }
  0x87   : > { %v1239_v59 = vpop.permute.xlu2 %1238 }
  0x88   : > { %1226 = vrot.lane.b32.xlu1 %v292_v12, %s2212_s15 }
  0x8a   : > { %v671_v26 = vpop.permute.xlu1 %670 }
  0x8c   : > { %v675_v27 = vpop.permute.xlu0 %674 }
  0x8d   : > { %1838 = vmatpush.xpose.msk.msrb.mxu3 %vm378_vm1, %v675_v27 }
  0x8f   : > { %v1235_v62 = vpop.permute.xlu2 %1234 }
  0x91   : > { %v346_v28 = vpop.f32.mrf.mxu0  ;;  %1839 = vmatpush.xpose.msk.msrb.mxu3 %vm378_vm1, %v673_v24 }
  0x92   : > { %v370_v29 = vmul.f32 0.35355338, %v346_v28  ;;  %v663_v31 = vpop.permute.xlu1 %662 }
  0x94   : > { %1210 = vrot.lane.b32.xlu1 %v370_v29, %s2212_s15  ;;  %646 = vrot.lane.b32.xlu2 %v370_v29, %s2209_s12  ;;  %v665_v42 = vpop.permute.xlu0 %664 }
  0x95   : > { %1821 = vmatmul.msk.f32.vlgmr.msra.gmra.mxu1 %vm378_vm1, %v370_v29  ;;  %1840 = vmatpush.xpose.msk.msrb.mxu3 %vm378_vm1, %v671_v26 }
  0x97   : > { %v352_v32 = vpop.f32.mrf.mxu3  ;;  %v951_v2 = vpop.permute.xlu2 %950 }
  0x98   : > { %v372_v33 = vmul.f32 0.35355338, %v352_v32 }
  0x99   : > { %v349_v34 = vpop.f32.mrf.mxu0  ;;  %1841 = vmatpush.xpose.msk.msrb.mxu3 %vm378_vm1, %v669_v30 }
  0x9a   : > { %v371_v35 = vmul.f32 0.35355338, %v349_v34  ;;  %1214 = vrot.lane.b32.xlu0 %v372_v33, %s2212_s15  ;;  %v1978_v36 = vpop.permute.xlu1 %1977 }
  0x9b   : > { %v1980_v38 = vunpack.i.h.bf16 %v1978_v36  ;;  %v1979_v39 = vunpack.i.l.bf16 %v1978_v36 }
  0x9c   : > { %928 = vrot.lane.b32.xlu2 %v370_v29, %s2211_s14  ;;  %1212 = vrot.lane.b32.xlu1 %v371_v35, %s2212_s15  ;;  %v945_v11 = vpop.permute.xlu0 %944 }
  0x9d   : > { %1822 = vmatmul.msk.f32.gmra.mxu1 %vm378_vm1, %v371_v35  ;;  %1842 = vmatpush.xpose.msk.msrb.mxu3 %vm378_vm1, %v667_v37 }
  0x9e   : > { %605 = vmatpush.msrb.mxu0 %v1979_v39  ;;  %1926 = vmatpush.msrb.mxu1 %v1979_v39 }
  0x9f   : > { %v355_v40 = vpop.f32.mrf.mxu3  ;;  %1927 = vmatpush.msra.mxu2 %v1979_v39  ;;  %v949_v4 = vpop.permute.xlu2 %948 }
  0xa0   : > { %v373_v41 = vmul.f32 0.35355338, %v355_v40  ;;  %606 = vmatpush.msrb.mxu0 %v1980_v38  ;;  %1928 = vmatpush.msrb.mxu1 %v1980_v38 }
  0xa1   : > { %1843 = vmatpush.xpose.msk.msrb.mxu3 %vm378_vm1, %v665_v42  ;;  %1929 = vmatpush.msra.mxu2 %v1980_v38 }
  0xa2   : > { %648 = vrot.lane.b32.xlu0 %v371_v35, %s2209_s12  ;;  %v1983_v43 = vpop.permute.xlu1 %1982 }
  0xa3   : > { %v1985_v44 = vunpack.i.h.bf16 %v1983_v43  ;;  %v1984_v45 = vunpack.i.l.bf16 %v1983_v43 }
  0xa4   : > { %650 = vrot.lane.b32.xlu2 %v372_v33, %s2209_s12  ;;  %652 = vrot.lane.b32.xlu1 %v373_v41, %s2209_s12 }
  0xa5   : > { %1823 = vmatmul.msk.f32.gmra.mxu1 %vm378_vm1, %v372_v33  ;;  %1844 = vmatpush.xpose.msk.msrb.mxu3 %vm378_vm1, %v663_v31 }
  0xa6   : > { %607 = vmatpush.msrb.mxu0 %v1984_v45  ;;  %1930 = vmatpush.msrb.mxu1 %v1984_v45 }
  0xa7   : > { %v358_v46 = vpop.f32.mrf.mxu3  ;;  %1931 = vmatpush.msra.mxu2 %v1984_v45  ;;  %v1229_v6 = vpop.permute.xlu2 %1228 }
  0xa8   : > { %v374_v47 = vmul.f32 0.35355338, %v358_v46  ;;  %608 = vmatpush.msrb.mxu0 %v1985_v44  ;;  %1932 = vmatpush.msrb.mxu1 %v1985_v44 }
  0xa9   : > { %1933 = vmatpush.msra.mxu2 %v1985_v44 }
  0xaa   : > { %936 = vrot.lane.b32.xlu0 %v374_v47, %s2211_s14  ;;  %v1993_v51 = vpop.permute.xlu1 %1992  ;;  %609 = vmatpush.msrb.mxu0 %v1989_v49 }
  0xab   : > { %v1994_v52 = vunpack.i.l.bf16 %v1993_v51  ;;  %1935 = vmatpush.msra.mxu2 %v1989_v49  ;;  %1934 = vmatpush.msrb.mxu1 %v1989_v49  ;;  %v1995_v54 = vunpack.i.h.bf16 %v1993_v51 }
  0xac   : > { %932 = vrot.lane.b32.xlu2 %v372_v33, %s2211_s14  ;;  %654 = vrot.lane.b32.xlu1 %v374_v47, %s2209_s12 }
  0xad   : > { %1824 = vmatmul.msk.f32.gmra.mxu1 %vm378_vm1, %v373_v41  ;;  %610 = vmatpush.msrb.mxu0 %v1990_v50 }
  0xae   : > { %1937 = vmatpush.msra.mxu2 %v1990_v50  ;;  %1936 = vmatpush.msrb.mxu1 %v1990_v50 }
  0xaf   : > { %v361_v53 = vpop.f32.mrf.mxu3  ;;  %611 = vmatpush.msrb.mxu0 %v1994_v52 }
  0xb0   : > { %v375_v55 = vmul.f32 0.35355338, %v361_v53  ;;  %1939 = vmatpush.msra.mxu2 %v1994_v52  ;;  %1938 = vmatpush.msrb.mxu1 %v1994_v52 }
  0xb1   : > { %612 = vmatpush.msrb.mxu0 %v1995_v54 }
  0xb2   : > { %656 = vrot.lane.b32.xlu0 %v375_v55, %s2209_s12  ;;  %v959_v56 = vpop.permute.xlu1 %958  ;;  %1941 = vmatpush.msra.mxu2 %v1995_v54 }
  0xb3   : > { %1940 = vmatpush.msrb.mxu1 %v1995_v54 }
  0xb4   : > { %934 = vrot.lane.b32.xlu1 %v373_v41, %s2211_s14  ;;  %930 = vrot.lane.b32.xlu2 %v371_v35, %s2211_s14 }
  0xb5   : > { %1825 = vmatmul.msk.f32.gmra.mxu1 %vm378_vm1, %v374_v47  ;;  %1861 = vmatpush.xpose.msk.msrb.mxu2 %vm378_vm1, %v959_v56 }
  0xb7   : > { %v364_v57 = vpop.f32.mrf.mxu3 }
  0xb8   : > { %v376_v58 = vmul.f32 0.35355338, %v364_v57 }
  0xba   : > { %1220 = vrot.lane.b32.xlu0 %v375_v55, %s2212_s15  ;;  %v1241_v60 = vpop.permute.xlu1 %1240 }
  0xbb   : > { %1885 = vmatpush.xpose.msk.msra.mxu3 %vm378_vm1, %v1241_v60 }
  0xbc   : > { %658 = vrot.lane.b32.xlu1 %v376_v58, %s2209_s12  ;;  %1216 = vrot.lane.b32.xlu2 %v373_v41, %s2212_s15 }
  0xbd   : > { %1826 = vmatmul.msk.f32.gmra.mxu1 %vm378_vm1, %v375_v55 }
  0xbf   : > { %1886 = vmatpush.xpose.msk.msra.mxu3 %vm378_vm1, %v1239_v59  ;;  %v367_v63 = vpop.f32.mrf.mxu3 }
  0xc0   : > { %v377_v0 = vmul.f32 0.35355338, %v367_v63 }
  0xc2   : > { %v957_v61 = vpop.permute.xlu1 %956  ;;  %942 = vrot.lane.b32.xlu0 %v377_v0, %s2211_s14 }
  0xc3   : > { %1862 = vmatpush.xpose.msk.msrb.mxu2 %vm378_vm1, %v957_v61 }
  0xc4   : > { %1218 = vrot.lane.b32.xlu1 %v374_v47, %s2212_s15  ;;  %938 = vrot.lane.b32.xlu2 %v375_v55, %s2211_s14 }
  0xc5   : > { %1827 = vmatmul.msk.f32.gmra.mxu1 %vm378_vm1, %v376_v58 }
  0xca   : > { %v955_v1 = vpop.permute.xlu1 %954 }
  0xcb   : > { %1863 = vmatpush.xpose.msk.msrb.mxu2 %vm378_vm1, %v955_v1 }
  0xcc   : > { %940 = vrot.lane.b32.xlu1 %v376_v58, %s2211_s14  ;;  %1222 = vrot.lane.b32.xlu2 %v376_v58, %s2212_s15 }
  0xcd   : > { %1828 = vmatmul.msk.f32.gmra.mxu1 %vm378_vm1, %v377_v0 }
  0xd2   : > { %v1237_v3 = vpop.permute.xlu1 %1236 }
  0xd3   : > { %1887 = vmatpush.xpose.msk.msra.mxu3 %vm378_vm1, %v1237_v3 }
  0xd4   : > { %660 = vrot.lane.b32.xlu2 %v377_v0, %s2209_s12  ;;  %1224 = vrot.lane.b32.xlu1 %v377_v0, %s2212_s15 }
  0xd7   : > { %1888 = vmatpush.xpose.msk.msra.mxu3 %vm378_vm1, %v1235_v62 }
  0xda   : > { %v953_v5 = vpop.permute.xlu1 %952 }
  0xdb   : > { %1864 = vmatpush.xpose.msk.msrb.mxu2 %vm378_vm1, %v953_v5 }
  0xdf   : > { %1865 = vmatpush.xpose.msk.msrb.mxu2 %vm378_vm1, %v951_v2 }
  0xe2   : > { %v1233_v7 = vpop.permute.xlu1 %1232 }
  0xe3   : > { %1866 = vmatpush.xpose.msk.msrb.mxu2 %vm378_vm1, %v949_v4  ;;  %1889 = vmatpush.xpose.msk.msra.mxu3 %vm378_vm1, %v1233_v7 }
  0xea   : > { %v1231_v8 = vpop.permute.xlu1 %1230 }
  0xeb   : > { %1890 = vmatpush.xpose.msk.msra.mxu3 %vm378_vm1, %v1231_v8 }
  0xee   : > { %v647_v9 = vpop.permute.xlu2 %646 }
  0xef   : > { %1845 = vmatmul.msk.f32.vlgmr.msrb.gmra.mxu3 %vm378_vm1, %v647_v9 }
  0xf0   : > { %1891 = vmatpush.xpose.msk.msra.mxu3 %vm378_vm1, %v1229_v6 }
  0xf2   : > { %v947_v10 = vpop.permute.xlu1 %946 }
  0xf3   : > { %1867 = vmatpush.xpose.msk.msrb.mxu2 %vm378_vm1, %v947_v10 }
  0xf6   : > { %v2418_v13 = vpop.permute.xlu2 %928 }
  0xf7   : > { %1868 = vmatpush.xpose.msk.msrb.mxu2 %vm378_vm1, %v945_v11 }
  0xfa   : > { %v1227_v12 = vpop.permute.xlu1 %1226 }
  0xfb   : > { %1892 = vmatpush.xpose.msk.msra.mxu3 %vm378_vm1, %v1227_v12 }
  0xfe   : > { %v651_v14 = vpop.permute.xlu2 %650 }
 0x106   : > { %v1211_v16 = vpop.permute.xlu1 %1210  ;;  %v2424_v23 = vpop.permute.xlu2 %932 }
 0x10c   : > { %v1215_v17 = vpop.permute.xlu0 %1214 }
 0x10e   : > { %v1213_v24 = vpop.permute.xlu1 %1212  ;;  %v2432_v28 = vpop.permute.xlu2 %930 }
 0x112   : > { %v2420_v19 = vpop.f32.mrf.mxu1 }
 0x113   : > { %v469_v20 = vsel %vm468_vm2, %v2420_v19, -inf }
 0x114   : > { %470 = vmax.xlane.f32.xlu2 %v469_v20  ;;  %v649_v25 = vpop.permute.xlu0 %648 }
 0x115   : > { %1846 = vmatmul.msk.f32.gmra.mxu3 %vm378_vm1, %v649_v25 }
 0x116   : > { %v653_v29 = vpop.permute.xlu1 %652  ;;  %v1217_v32 = vpop.permute.xlu2 %1216 }
 0x11a   : > { %v2427_v26 = vpop.f32.mrf.mxu1 }
 0x11b   : > { %v472_v27 = vsel %vm468_vm2, %v2427_v26, -inf }
 0x11c   : > { %473 = vmax.xlane.f32.xlu0 %v472_v27  ;;  %v2441_v35 = vpop.permute.xlu0 %936 }
 0x11d   : > { %1847 = vmatmul.msk.f32.gmra.mxu3 %vm378_vm1, %v651_v14 }
 0x11e   : > { %v655_v33 = vpop.permute.xlu1 %654  ;;  %v2444_v36 = vpop.permute.xlu2 %938 }
 0x122   : > { %v2434_v30 = vpop.f32.mrf.mxu1 }
 0x123   : > { %v475_v31 = vsel %vm468_vm2, %v2434_v30, -inf }
 0x124   : > { %476 = vmax.xlane.f32.xlu1 %v475_v31  ;;  %v657_v40 = vpop.permute.xlu0 %656 }
 0x125   : > { %1848 = vmatmul.msk.f32.gmra.mxu3 %vm378_vm1, %v653_v29 }
 0x126   : > { %v2448_v38 = vpop.permute.xlu1 %934  ;;  %v1223_v41 = vpop.permute.xlu2 %1222 }
 0x12a   : > { %v2439_v34 = vpop.f32.mrf.mxu1 }
 0x12b   : > { %v478_v50 = vsel %vm468_vm2, %v2439_v34, -inf }
 0x12c   : > { %v1221_v48 = vpop.permute.xlu0 %1220 }
 0x12d   : > { %1849 = vmatmul.msk.f32.gmra.mxu3 %vm378_vm1, %v655_v33 }
 0x12e   : > { %v659_v44 = vpop.permute.xlu1 %658  ;;  %v661_v45 = vpop.permute.xlu2 %660 }
 0x132   : > { %v2446_v37 = vpop.f32.mrf.mxu1 }
 0x133   : > { %v481_v39 = vsel %vm468_vm2, %v2446_v37, -inf }
 0x134   : > { %482 = vmax.xlane.f32.xlu0 %v481_v39  ;;  %v2485_v55 = vpop.permute.xlu0 %942 }
 0x135   : > { %1850 = vmatmul.msk.f32.gmra.mxu3 %vm378_vm1, %v657_v40 }
 0x136   : > { %v1219_v46 = vpop.permute.xlu1 %1218 }
 0x13a   : > { %v2453_v42 = vpop.f32.mrf.mxu1 }
 0x13b   : > { %v484_v43 = vsel %vm468_vm2, %v2453_v42, -inf }
 0x13c   : > { %485 = vmax.xlane.f32.xlu2 %v484_v43 }
 0x13d   : > { %2002 = vrot.lane.b32.xlu1 %v2323_v18, %s2213_s16  ;;  %1851 = vmatmul.msk.f32.gmra.mxu3 %vm378_vm1, %v659_v44 }
 0x13e   : > { %v2479_v52 = vpop.permute.xlu1 %940 }
 0x142   : > { %v2470_v47 = vpop.f32.mrf.mxu1 }
 0x143   : > { %v487_v49 = vsel %vm468_vm2, %v2470_v47, -inf }
 0x145   : > { %1852 = vmatmul.msk.f32.gmra.mxu3 %vm378_vm1, %v661_v45  ;;  %2017 = vrot.lane.b32.xlu1 %v2315_v15, %s2214_s17 }
 0x146   : > { %v1225_v54 = vpop.permute.xlu1 %1224 }
 0x148   : > { %2007 = vrot.lane.b32.xlu0 %v2333_v22, %s2213_s16 }
 0x14a   : > { %v2477_v51 = vpop.f32.mrf.mxu1 }
 0x14b   : > { %v490_v53 = vsel %vm468_vm2, %v2477_v51, -inf }
 0x14d   : > { %1893 = vmatmul.msk.f32.vlgmr.msra.gmra.mxu3 %vm378_vm1, %v1211_v16 }
 0x150   : > { %2012 = vrot.lane.b32.xlu0 %v2330_v21, %s2213_s16 }
 0x154   : > { %1997 = vrot.lane.b32.xlu2 %v2315_v15, %s2213_s16 }
 0x155   : > { %1894 = vmatmul.msk.f32.gmra.mxu3 %vm378_vm1, %v1213_v24 }
 0x15d   : > { %1895 = vmatmul.msk.f32.gmra.mxu3 %vm378_vm1, %v1215_v17 }
 0x165   : > { %1896 = vmatmul.msk.f32.gmra.mxu3 %vm378_vm1, %v1217_v32 }
 0x16d   : > { %1897 = vmatmul.msk.f32.gmra.mxu3 %vm378_vm1, %v1219_v46 }
 0x172   : > { %v2489_v61 = vpop.f32.mrf.mxu3 }
 0x175   : > { %1898 = vmatmul.msk.f32.gmra.mxu3 %vm378_vm1, %v1221_v48 }
 0x17a   : > { %488 = vmax.xlane.f32.xlu0 %v487_v49 }
 0x17d   : > { %479 = vmax.xlane.f32.xlu2 %v478_v50  ;;  %1899 = vmatmul.msk.f32.gmra.mxu3 %vm378_vm1, %v1223_v41  ;;  %v751_v41 = vsel %vm468_vm2, %v2489_v61, -inf }
 0x182   : > { %491 = vmax.xlane.f32.xlu0 %v490_v53 }
 0x185   : > { %1900 = vmatmul.msk.f32.gmra.mxu3 %vm378_vm1, %v1225_v54 }
 0x187   : > { %v471_v56 = vpop.xlane.xlu2 %470 }
 0x188   : > { %v493_v57 = vsub.f32 %v2420_v19, %v471_v56 }
 0x18a   : > { %v501_v58 = vmul.f32 1.442695, %v493_v57 }
 0x18c   : > { %2057 = vpow2.f32 %v501_v58 }
 0x18f   : > { %v474_v59 = vpop.xlane.xlu0 %473 }
 0x190   : > { %v494_v60 = vsub.f32 %v2427_v26, %v474_v59 }
 0x192   : > { %v2491_v62 = vpop.eup %2057  ;;  %v503_v63 = vmul.f32 1.442695, %v494_v60 }
 0x193   : > { %1829 = vmatmul.msk.f32.vlgmr.msrb.gmra.mxu0 %vm468_vm2, %v2491_v62  ;;  %v517_v53 = vsel %vm468_vm2, %v2491_v62, 0.0 }
 0x194   : > { %2059 = vpow2.f32 %v503_v63 }
 0x195   : > { %2022 = vrot.lane.b32.xlu2 %v2315_v15, %s2215_s18 }
 0x196   : > { %2027 = vrot.lane.b32.xlu0 %v2323_v18, %s2214_s17 }
 0x197   : > { %v477_v0 = vpop.xlane.xlu1 %476 }
 0x198   : > { %v495_v1 = vsub.f32 %v2434_v30, %v477_v0  ;;  %v2500_v2 = vpop.f32.mrf.mxu3 }
 0x199   : > { %v754_v46 = vsel %vm468_vm2, %v2500_v2, -inf }
 0x19a   : > { %v2502_v3 = vpop.eup %2059  ;;  %v505_v4 = vmul.f32 1.442695, %v495_v1 }
 0x19b   : > { %1830 = vmatmul.msk.f32.gmra.mxu0 %vm468_vm2, %v2502_v3 }
 0x19c   : > { %2061 = vpow2.f32 %v505_v4 }
 0x19d   : > { %2032 = vrot.lane.b32.xlu2 %v2323_v18, %s2215_s18 }
 0x19e   : > { %2037 = vrot.lane.b32.xlu0 %v2333_v22, %s2214_s17 }
 0x1a0   : > { %v2510_v15 = vpop.f32.mrf.mxu3 }
 0x1a1   : > { %v757_v6 = vsel %vm468_vm2, %v2510_v15, -inf }
 0x1a2   : > { %v2512_v5 = vpop.eup %2061  ;;  %758 = vmax.xlane.f32.xlu1 %v757_v6 }
 0x1a3   : > { %1831 = vmatmul.msk.f32.gmra.mxu0 %vm468_vm2, %v2512_v5 }
 0x1a5   : > { %2042 = vrot.lane.b32.xlu2 %v2333_v22, %s2215_s18 }
 0x1a7   : > { %v483_v7 = vpop.xlane.xlu0 %482 }
 0x1a8   : > { %v497_v18 = vsub.f32 %v2446_v37, %v483_v7  ;;  %v2521_v8 = vpop.f32.mrf.mxu3 }
 0x1a9   : > { %v760_v43 = vsel %vm468_vm2, %v2521_v8, -inf }
 0x1aa   : > { %v509_v9 = vmul.f32 1.442695, %v497_v18 }
 0x1ac   : > { %2063 = vpow2.f32 %v509_v9 }
 0x1ad   : > { %2047 = vrot.lane.b32.xlu2 %v2330_v21, %s2214_s17 }
 0x1af   : > { %v486_v10 = vpop.xlane.xlu2 %485  ;;  %v2003_v17 = vpop.permute.xlu1 %2002 }
 0x1b0   : > { %v498_v11 = vsub.f32 %v2453_v42, %v486_v10  ;;  %v2526_v12 = vpop.f32.mrf.mxu3  ;;  %v2004_v27 = vunpack.i.l.bf16 %v2003_v17  ;;  %v2005_v29 = vunpack.i.h.bf16 %v2003_v17 }
 0x1b1   : > { %v763_v49 = vsel %vm468_vm2, %v2526_v12, -inf }
 0x1b2   : > { %v2528_v14 = vpop.eup %2063  ;;  %v511_v16 = vmul.f32 1.442695, %v498_v11 }
 0x1b3   : > { %1833 = vmatmul.msk.f32.vlgmr.msra.gmra.mxu2 %vm468_vm2, %v2528_v14 }
 0x1b4   : > { %2065 = vpow2.f32 %v511_v16 }
 0x1b7   : > { %v1998_v22 = vpop.permute.xlu2 %1997  ;;  %v2018_v56 = vpop.permute.xlu1 %2017 }
 0x1b8   : > { %v2000_v19 = vunpack.i.h.bf16 %v1998_v22  ;;  %v1999_v20 = vunpack.i.l.bf16 %v1998_v22  ;;  %v2532_v24 = vpop.f32.mrf.mxu3  ;;  %v2020_v57 = vunpack.i.h.bf16 %v2018_v56  ;;  %v2019_v58 = vunpack.i.l.bf16 %v2018_v56 }
 0x1b9   : > { %v766_v54 = vsel %vm468_vm2, %v2532_v24, -inf }
 0x1ba   : > { %v2534_v25 = vpop.eup %2065  ;;  %v2008_v26 = vpop.permute.xlu0 %2007  ;;  %887 = vmatpush.msra.mxu0 %v1999_v20  ;;  %1169 = vmatpush.msra.mxu1 %v2019_v58 }
 0x1bb   : > { %1834 = vmatmul.msk.f32.gmra.mxu2 %vm468_vm2, %v2534_v25  ;;  %v2009_v30 = vunpack.i.l.bf16 %v2008_v26  ;;  %v2010_v32 = vunpack.i.h.bf16 %v2008_v26 }
 0x1bc   : > { %888 = vmatpush.msra.mxu0 %v2000_v19  ;;  %1170 = vmatpush.msra.mxu1 %v2020_v57 }
 0x1be   : > { %889 = vmatpush.msra.mxu0 %v2004_v27 }
 0x1c0   : > { %890 = vmatpush.msra.mxu0 %v2005_v29  ;;  %v2538_v31 = vpop.f32.mrf.mxu3 }
 0x1c1   : > { %v769_v37 = vsel %vm468_vm2, %v2538_v31, -inf }
 0x1c2   : > { %v2013_v33 = vpop.permute.xlu0 %2012  ;;  %891 = vmatpush.msra.mxu0 %v2009_v30  ;;  %770 = vmax.xlane.f32.xlu1 %v769_v37 }
 0x1c3   : > { %v2014_v39 = vunpack.i.l.bf16 %v2013_v33  ;;  %v2015_v40 = vunpack.i.h.bf16 %v2013_v33 }
 0x1c4   : > { %892 = vmatpush.msra.mxu0 %v2010_v32 }
 0x1c6   : > { %893 = vmatpush.msra.mxu0 %v2014_v39 }
 0x1c8   : > { %894 = vmatpush.msra.mxu0 %v2015_v40  ;;  %752 = vmax.xlane.f32.xlu0 %v751_v41  ;;  %v2544_v42 = vpop.f32.mrf.mxu3 }
 0x1c9   : > { %v772_v48 = vsel %vm468_vm2, %v2544_v42, -inf }
 0x1d0   : > { %761 = vmax.xlane.f32.xlu0 %v760_v43  ;;  %v2548_v44 = vpop.f32.mrf.mxu3 }
 0x1d1   : > { %v1315_v45 = vsel %vm468_vm2, %v2548_v44, -inf }
 0x1d2   : > { %1316 = vmax.xlane.f32.xlu1 %v1315_v45 }
 0x1d6   : > { %755 = vmax.xlane.f32.xlu2 %v754_v46 }
 0x1d8   : > { %773 = vmax.xlane.f32.xlu0 %v772_v48  ;;  %v2558_v50 = vpop.f32.mrf.mxu3 }
 0x1d9   : > { %v1318_v63 = vsel %vm468_vm2, %v2558_v50, -inf }
 0x1de   : > { %764 = vmax.xlane.f32.xlu2 %v763_v49 }
 0x1e0   : > { %518 = vadd.xlane.f32.xlu0 %v517_v53  ;;  %v2564_v59 = vpop.f32.mrf.mxu3 }
 0x1e6   : > { %767 = vmax.xlane.f32.xlu2 %v766_v54  ;;  %v1321_v54 = vsel %vm468_vm2, %v2564_v59, -inf }
 0x1e8   : > { %v2572_v6 = vpop.f32.mrf.mxu3 }
 0x1eb   : > { %2052 = vrot.lane.b32.xlu1 %v2330_v21, %s2215_s18  ;;  %v529_v21 = vsel %vm468_vm2, %v2528_v14, 0.0 }
 0x1ed   : > { %v489_v60 = vpop.xlane.xlu0 %488 }
 0x1ee   : > { %v499_v62 = vsub.f32 %v2470_v47, %v489_v60  ;;  %1319 = vmax.xlane.f32.xlu2 %v1318_v63  ;;  %v523_v60 = vsel %vm468_vm2, %v2512_v5, 0.0 }
 0x1f0   : > { %v513_v0 = vmul.f32 1.442695, %v499_v62  ;;  %v480_v1 = vpop.xlane.xlu2 %479  ;;  %v2581_v17 = vpop.f32.mrf.mxu3 }
 0x1f1   : > { %v496_v4 = vsub.f32 %v2439_v34, %v480_v1  ;;  %v1327_v27 = vsel %vm468_vm2, %v2581_v17, -inf }
 0x1f2   : > { %2067 = vpow2.f32 %v513_v0 }
 0x1f3   : > { %v507_v7 = vmul.f32 1.442695, %v496_v4 }
 0x1f5   : > { %2069 = vpow2.f32 %v507_v7  ;;  %v492_v18 = vpop.xlane.xlu0 %491 }
 0x1f6   : > { %v500_v9 = vsub.f32 %v2477_v51, %v492_v18  ;;  %530 = vadd.xlane.f32.xlu2 %v529_v21  ;;  %v1324_v51 = vsel %vm468_vm2, %v2572_v6, -inf }
 0x1f8   : > { %v2577_v10 = vpop.eup %2067  ;;  %v515_v47 = vmul.f32 1.442695, %v500_v9  ;;  %v2023_v11 = vpop.permute.xlu2 %2022 }
 0x1f9   : > { %1835 = vmatmul.msk.f32.gmra.mxu2 %vm468_vm2, %v2577_v10  ;;  %v2025_v34 = vunpack.i.h.bf16 %v2023_v11  ;;  %v2024_v16 = vunpack.i.l.bf16 %v2023_v11  ;;  %v2592_v29 = vpop.f32.mrf.mxu3 }
 0x1fa   : > { %2071 = vpow2.f32 %v515_v47  ;;  %v1330_v41 = vsel %vm468_vm2, %v2592_v29, -inf }
 0x1fb   : > { %v2070_v22 = vpop.eup %2069  ;;  %1451 = vmatpush.msrb.mxu0 %v2024_v16 }
 0x1fc   : > { %1832 = vmatmul.msk.f32.vlgmr.msrb.gmra.mxu1 %vm468_vm2, %v2070_v22 }
 0x1fd   : > { %1452 = vmatpush.msrb.mxu0 %v2025_v34 }
 0x1fe   : > { %1325 = vmax.xlane.f32.xlu2 %v1324_v51 }
 0x200   : > { %v2586_v14 = vpop.eup %2071  ;;  %v2033_v19 = vpop.permute.xlu2 %2032 }
 0x201   : > { %1836 = vmatmul.msk.f32.gmra.mxu2 %vm468_vm2, %v2586_v14  ;;  %v2035_v20 = vunpack.i.h.bf16 %v2033_v19  ;;  %v2034_v26 = vunpack.i.l.bf16 %v2033_v19  ;;  %v2598_v43 = vpop.f32.mrf.mxu3 }
 0x202   : > { %v1333_v56 = vsel %vm468_vm2, %v2598_v43, -inf }
 0x203   : > { %1453 = vmatpush.msrb.mxu0 %v2034_v26 }
 0x205   : > { %1454 = vmatpush.msrb.mxu0 %v2035_v20 }
 0x206   : > { %1328 = vmax.xlane.f32.xlu2 %v1327_v27 }
 0x208   : > { %v2028_v30 = vpop.permute.xlu0 %2027  ;;  %v2043_v32 = vpop.permute.xlu2 %2042 }
 0x209   : > { %v2030_v33 = vunpack.i.h.bf16 %v2028_v30  ;;  %v2029_v37 = vunpack.i.l.bf16 %v2028_v30  ;;  %1869 = vmatmul.msk.f32.vlgmr.msrb.gmra.mxu2 %vm378_vm1, %v2418_v13  ;;  %v2045_v39 = vunpack.i.h.bf16 %v2043_v32  ;;  %v2044_v40 = vunpack.i.l.bf16 %v2043_v32  ;;  %v2608_v57 = vpop.f32.mrf.mxu3 }
 0x20a   : > { %v1336_v58 = vsel %vm468_vm2, %v2608_v57, -inf }
 0x20b   : > { %1171 = vmatpush.msra.mxu1 %v2029_v37  ;;  %1455 = vmatpush.msrb.mxu0 %v2044_v40 }
 0x20d   : > { %1172 = vmatpush.msra.mxu1 %v2030_v33  ;;  %1456 = vmatpush.msrb.mxu0 %v2045_v39 }
 0x20e   : > { %1331 = vmax.xlane.f32.xlu2 %v1330_v41 }
 0x210   : > { %v2038_v45 = vpop.permute.xlu0 %2037  ;;  %v2048_v49 = vpop.permute.xlu2 %2047 }
 0x211   : > { %v2040_v46 = vunpack.i.h.bf16 %v2038_v45  ;;  %v2039_v48 = vunpack.i.l.bf16 %v2038_v45  ;;  %1870 = vmatmul.msk.f32.gmra.mxu2 %vm378_vm1, %v2432_v28  ;;  %v2049_v13 = vunpack.i.l.bf16 %v2048_v49  ;;  %v2050_v53 = vunpack.i.h.bf16 %v2048_v49 }
 0x212   : > { %v520_v28 = vsel %vm468_vm2, %v2502_v3, 0.0  ;;  %v532_v3 = vsel %vm468_vm2, %v2534_v25, 0.0 }
 0x213   : > { %1173 = vmatpush.msra.mxu1 %v2039_v48 }
 0x215   : > { %1174 = vmatpush.msra.mxu1 %v2040_v46  ;;  %1322 = vmax.xlane.f32.xlu1 %v1321_v54  ;;  %v759_v63 = vpop.xlane.xlu1 %758 }
 0x216   : > { %1334 = vmax.xlane.f32.xlu2 %v1333_v56 }
 0x217   : > { %1175 = vmatpush.msra.mxu1 %v2049_v13 }
 0x219   : > { %1871 = vmatmul.msk.f32.gmra.mxu2 %vm378_vm1, %v2424_v23  ;;  %1176 = vmatpush.msra.mxu1 %v2050_v53  ;;  %v526_v23 = vsel %vm468_vm2, %v2070_v22, 0.0 }
 0x21d   : > { %521 = vadd.xlane.f32.xlu1 %v520_v28 }
 0x21e   : > { %1337 = vmax.xlane.f32.xlu2 %v1336_v58 }
 0x221   : > { %1872 = vmatmul.msk.f32.gmra.mxu2 %vm378_vm1, %v2448_v38 }
 0x225   : > { %524 = vadd.xlane.f32.xlu1 %v523_v60 }
 0x229   : > { %1873 = vmatmul.msk.f32.gmra.mxu2 %vm378_vm1, %v2441_v35 }
 0x22d   : > { %527 = vadd.xlane.f32.xlu1 %v526_v23 }
 0x231   : > { %1874 = vmatmul.msk.f32.gmra.mxu2 %vm378_vm1, %v2444_v36 }
 0x235   : > { %v771_v62 = vpop.xlane.xlu1 %770  ;;  %533 = vadd.xlane.f32.xlu1 %v532_v3 }
 0x236   : > { %v781_v38 = vsub.f32 %v2538_v31, %v771_v62  ;;  %v626_v28 = vpop.f32.mrf.mxu2 }
 0x238   : > { %v795_v0 = vmul.f32 1.442695, %v781_v38 }
 0x239   : > { %1875 = vmatmul.msk.f32.gmra.mxu2 %vm378_vm1, %v2479_v52 }
 0x23a   : > { %2073 = vpow2.f32 %v795_v0 }
 0x23b   : > { %v753_v35 = vpop.xlane.xlu0 %752 }
 0x23c   : > { %v775_v5 = vsub.f32 %v2489_v61, %v753_v35 }
 0x23e   : > { %v783_v1 = vmul.f32 1.442695, %v775_v5  ;;  %v2661_v3 = vpop.f32.mrf.mxu2 }
 0x240   : > { %2075 = vpow2.f32 %v783_v1  ;;  %v2629_v4 = vpop.eup %2073 }
 0x241   : > { %1876 = vmatmul.msk.f32.gmra.mxu2 %vm378_vm1, %v2485_v55  ;;  %v817_v36 = vsel %vm468_vm2, %v2629_v4, 0.0  ;;  %v777_v55 = vsub.f32 %v2510_v15, %v759_v63 }
 0x242   : > { %818 = vadd.xlane.f32.xlu2 %v817_v36 }
 0x243   : > { %v787_v47 = vmul.f32 1.442695, %v777_v55  ;;  %v762_v34 = vpop.xlane.xlu0 %761 }
 0x244   : > { %v778_v51 = vsub.f32 %v2521_v8, %v762_v34 }
 0x245   : > { %v1317_v31 = vpop.xlane.xlu1 %1316 }
 0x246   : > { %v2076_v25 = vpop.eup %2075  ;;  %v1339_v7 = vsub.f32 %v2548_v44, %v1317_v31  ;;  %v789_v15 = vmul.f32 1.442695, %v778_v51 }
 0x247   : > { %1853 = vmatmul.msk.f32.vlgmr.msra.gmra.mxu0 %vm468_vm2, %v2076_v25  ;;  %v799_v52 = vsel %vm468_vm2, %v2076_v25, 0.0  ;;  %v2673_v25 = vpop.f32.mrf.mxu0 }
 0x248   : > { %800 = vadd.xlane.f32.xlu0 %v799_v52  ;;  %v1347_v61 = vmul.f32 1.442695, %v1339_v7 }
 0x249   : > { %v756_v18 = vpop.xlane.xlu2 %755 }
 0x24a   : > { %v776_v21 = vsub.f32 %v2500_v2, %v756_v18  ;;  %2077 = vpow2.f32 %v1347_v61 }
 0x24b   : > { %v774_v40 = vpop.xlane.xlu0 %773 }
 0x24c   : > { %v785_v9 = vmul.f32 1.442695, %v776_v21 }
 0x24e   : > { %2079 = vpow2.f32 %v785_v9 }
 0x24f   : > { %2081 = vpow2.f32 %v787_v47 }
 0x250   : > { %v2640_v11 = vpop.eup %2077  ;;  %2083 = vpow2.f32 %v789_v15 }
 0x251   : > { %v765_v16 = vpop.xlane.xlu2 %764  ;;  %v1363_v44 = vsel %vm468_vm2, %v2640_v11, 0.0 }
 0x252   : > { %1364 = vadd.xlane.f32.xlu2 %v1363_v44  ;;  %v779_v27 = vsub.f32 %v2526_v12, %v765_v16  ;;  %v782_v12 = vsub.f32 %v2544_v42, %v774_v40 }
 0x254   : > { %v2080_v22 = vpop.eup %2079  ;;  %v791_v39 = vmul.f32 1.442695, %v779_v27  ;;  %v797_v53 = vmul.f32 1.442695, %v782_v12 }
 0x255   : > { %1854 = vmatmul.msk.f32.gmra.mxu0 %vm468_vm2, %v2080_v22  ;;  %v802_v2 = vsel %vm468_vm2, %v2080_v22, 0.0  ;;  %v2082_v20 = vpop.eup %2081 }
 0x256   : > { %803 = vadd.xlane.f32.xlu0 %v802_v2  ;;  %v805_v32 = vsel %vm468_vm2, %v2082_v20, 0.0  ;;  %v2084_v45 = vpop.eup %2083 }
 0x257   : > { %v808_v13 = vsel %vm468_vm2, %v2084_v45, 0.0 }
 0x259   : > { %v768_v19 = vpop.xlane.xlu2 %767 }
 0x25a   : > { %v780_v26 = vsub.f32 %v2532_v24, %v768_v19 }
 0x25c   : > { %v793_v30 = vmul.f32 1.442695, %v780_v26 }
 0x25d   : > { %1855 = vmatmul.msk.f32.gmra.mxu0 %vm468_vm2, %v2082_v20  ;;  %v2053_v8 = vpop.permute.xlu1 %2052 }
 0x25e   : > { %2085 = vpow2.f32 %v793_v30  ;;  %806 = vadd.xlane.f32.xlu0 %v805_v32  ;;  %v2055_v33 = vunpack.i.h.bf16 %v2053_v8  ;;  %v2054_v37 = vunpack.i.l.bf16 %v2053_v8 }
 0x25f   : > { %2087 = vpow2.f32 %v791_v39 }
 0x260   : > { %1457 = vmatpush.msrb.mxu0 %v2054_v37 }
 0x261   : > { %v1320_v41 = vpop.xlane.xlu2 %1319 }
 0x262   : > { %v1340_v24 = vsub.f32 %v2558_v50, %v1320_v41  ;;  %1458 = vmatpush.msrb.mxu0 %v2055_v33 }
 0x264   : > { %v2086_v46 = vpop.eup %2085  ;;  %v1349_v48 = vmul.f32 1.442695, %v1340_v24 }
 0x265   : > { %1856 = vmatmul.msk.f32.gmra.mxu0 %vm468_vm2, %v2084_v45  ;;  %v814_v49 = vsel %vm468_vm2, %v2086_v46, 0.0  ;;  %v2088_v56 = vpop.eup %2087 }
 0x266   : > { %2089 = vpow2.f32 %v1349_v48  ;;  %815 = vadd.xlane.f32.xlu1 %v814_v49  ;;  %809 = vadd.xlane.f32.xlu0 %v808_v13  ;;  %v811_v58 = vsel %vm468_vm2, %v2088_v56, 0.0  ;;  %v2719_v13 = vpop.xlane.xlu0 %518 }
 0x269   : > { %v531_v54 = vpop.xlane.xlu2 %530 }
 0x26a   : > { %2091 = vrcp.f32 %v531_v54 }
 0x26b   : > { %2093 = vpow2.f32 %v797_v53 }
 0x26c   : > { %v2090_v50 = vpop.eup %2089 }
 0x26d   : > { %1857 = vmatmul.msk.f32.gmra.mxu0 %vm468_vm2, %v2088_v56  ;;  %v1366_v42 = vsel %vm468_vm2, %v2090_v50, 0.0 }
 0x26e   : > { %1367 = vadd.xlane.f32.xlu2 %v1366_v42  ;;  %812 = vadd.xlane.f32.xlu0 %v811_v58 }
 0x270   : > { %v2092_v60 = vpop.eup %2091 }
 0x271   : > { %v2659_v23 = vmul.f32 %v2092_v60, %v626_v28  ;;  %v2094_v63 = vpop.eup %2093  ;;  %v1326_v38 = vpop.xlane.xlu2 %1325 }
 0x272   : > { %v820_v62 = vsel %vm468_vm2, %v2094_v63, 0.0  ;;  %v1342_v31 = vsub.f32 %v2572_v6, %v1326_v38 }
 0x274   : > { %v1353_v18 = vmul.f32 1.442695, %v1342_v31 }
 0x275   : > { %1858 = vmatmul.msk.f32.gmra.mxu0 %vm468_vm2, %v2086_v46 }
 0x276   : > { %821 = vadd.xlane.f32.xlu0 %v820_v62 }
 0x279   : > { %v1329_v5 = vpop.xlane.xlu2 %1328 }
 0x27a   : > { %v1343_v55 = vsub.f32 %v2581_v17, %v1329_v5 }
 0x27c   : > { %v2665_v0 = vpop.f32.mrf.mxu2  ;;  %v1355_v34 = vmul.f32 1.442695, %v1343_v55 }
 0x27d   : > { %1859 = vmatmul.msk.f32.gmra.mxu0 %vm468_vm2, %v2629_v4 }
 0x281   : > { %v1332_v61 = vpop.xlane.xlu2 %1331 }
 0x282   : > { %v1344_v17 = vsub.f32 %v2592_v29, %v1332_v61 }
 0x284   : > { %v2669_v35 = vpop.f32.mrf.mxu2  ;;  %v1357_v20 = vmul.f32 1.442695, %v1344_v17 }
 0x285   : > { %1860 = vmatmul.msk.f32.gmra.mxu0 %vm468_vm2, %v2094_v63 }
 0x288   : > { %v1323_v1 = vpop.xlane.xlu1 %1322 }
 0x289   : > { %v1341_v36 = vsub.f32 %v2564_v59, %v1323_v1  ;;  %v1335_v16 = vpop.xlane.xlu2 %1334 }
 0x28a   : > { %v1345_v51 = vsub.f32 %v2598_v43, %v1335_v16 }
 0x28b   : > { %v1351_v7 = vmul.f32 1.442695, %v1341_v36 }
 0x28c   : > { %v2676_v52 = vpop.f32.mrf.mxu2  ;;  %v1359_v30 = vmul.f32 1.442695, %v1345_v51 }
 0x28d   : > { %1901 = vmatmul.msk.f32.vlgmr.msrb.gmra.mxu0 %vm468_vm2, %v2640_v11  ;;  %v1033_v4 = vsel %vm468_vm2, %v2676_v52, -inf  ;;  %2095 = vpow2.f32 %v1351_v7  ;;  %v2691_v11 = vpop.f32.mrf.mxu0 }
 0x28e   : > { %1034 = vmax.xlane.f32.xlu0 %v1033_v4  ;;  %2097 = vpow2.f32 %v1353_v18 }
 0x290   : > { %v2682_v21 = vpop.xlane.xlu1 %521 }
 0x291   : > { %v1338_v48 = vpop.xlane.xlu2 %1337 }
 0x292   : > { %v1346_v53 = vsub.f32 %v2608_v57, %v1338_v48 }
 0x293   : > { %v2096_v59 = vpop.eup %2095 }
 0x294   : > { %v2685_v6 = vpop.f32.mrf.mxu2  ;;  %v1369_v9 = vsel %vm468_vm2, %v2096_v59, 0.0  ;;  %v2098_v22 = vpop.eup %2097  ;;  %v1361_v56 = vmul.f32 1.442695, %v1346_v53 }
 0x295   : > { %1902 = vmatmul.msk.f32.gmra.mxu0 %vm468_vm2, %v2090_v50  ;;  %v1036_v47 = vsel %vm468_vm2, %v2685_v6, -inf  ;;  %1370 = vadd.xlane.f32.xlu2 %v1369_v9  ;;  %v1372_v15 = vsel %vm468_vm2, %v2098_v22, 0.0  ;;  %v620_v27 = vpop.f32.mrf.mxu0 }
 0x296   : > { %1037 = vmax.xlane.f32.xlu0 %v1036_v47 }
 0x298   : > { %v525_v44 = vpop.xlane.xlu1 %524 }
 0x299   : > { %2099 = vrcp.f32 %v525_v44 }
 0x29a   : > { %2101 = vpow2.f32 %v1355_v34 }
 0x29b   : > { %2103 = vpow2.f32 %v1357_v20 }
 0x29c   : > { %v2695_v2 = vpop.f32.mrf.mxu2  ;;  %2105 = vpow2.f32 %v1359_v30 }
 0x29d   : > { %1903 = vmatmul.msk.f32.gmra.mxu0 %vm468_vm2, %v2096_v59  ;;  %v1039_v19 = vsel %vm468_vm2, %v2695_v2, -inf  ;;  %1373 = vadd.xlane.f32.xlu2 %v1372_v15 }
 0x29e   : > { %1040 = vmax.xlane.f32.xlu0 %v1039_v19 }
 0x29f   : > { %v2100_v26 = vpop.eup %2099 }
 0x2a0   : > { %v2701_v32 = vpop.xlane.xlu1 %527  ;;  %v2703_v29 = vmul.f32 %v2100_v26, %v620_v27  ;;  %v2102_v43 = vpop.eup %2101 }
 0x2a1   : > { %v1375_v33 = vsel %vm468_vm2, %v2102_v43, 0.0  ;;  %v2104_v39 = vpop.eup %2103 }
 0x2a2   : > { %v2106_v41 = vpop.eup %2105  ;;  %v1378_v24 = vsel %vm468_vm2, %v2104_v39, 0.0 }
 0x2a3   : > { %v1381_v45 = vsel %vm468_vm2, %v2106_v41, 0.0 }
 0x2a4   : > { %v2705_v8 = vpop.f32.mrf.mxu2 }
 0x2a5   : > { %1904 = vmatmul.msk.f32.gmra.mxu0 %vm468_vm2, %v2098_v22  ;;  %v1042_v37 = vsel %vm468_vm2, %v2705_v8, -inf  ;;  %1376 = vadd.xlane.f32.xlu2 %v1375_v33 }
 0x2a6   : > { %1043 = vmax.xlane.f32.xlu0 %v1042_v37 }
 0x2a8   : > { %v534_v40 = vpop.xlane.xlu1 %533 }
 0x2a9   : > { %2107 = vrcp.f32 %v534_v40 }
 0x2aa   : > { %2109 = vpow2.f32 %v1361_v56 }
 0x2ac   : > { %v2714_v12 = vpop.f32.mrf.mxu2 }
 0x2ad   : > { %1905 = vmatmul.msk.f32.gmra.mxu0 %vm468_vm2, %v2102_v43  ;;  %1382 = vadd.xlane.f32.xlu2 %v1381_v45  ;;  %v1045_v54 = vsel %vm468_vm2, %v2714_v12, -inf }
 0x2ae   : > { %1379 = vadd.xlane.f32.xlu0 %v1378_v24 }
 0x2af   : > { %v2108_v46 = vpop.eup %2107 }
 0x2b0   : > { %v2717_v49 = vmul.f32 %v2108_v46, %v2661_v3  ;;  %v2110_v58 = vpop.eup %2109 }
 0x2b1   : > { %v1384_v3 = vsel %vm468_vm2, %v2110_v58, 0.0 }
 0x2b4   : > { %v2725_v28 = vpop.f32.mrf.mxu2 }
 0x2b5   : > { %1906 = vmatmul.msk.f32.gmra.mxu0 %vm468_vm2, %v2104_v39  ;;  %v1048_v42 = vsel %vm468_vm2, %v2725_v28, -inf  ;;  %v819_v17 = vpop.xlane.xlu2 %818 }
 0x2b6   : > { %1046 = vmax.xlane.f32.xlu0 %v1045_v54 }
 0x2bb   : > { %v801_v50 = vpop.xlane.xlu0 %800 }
 0x2bc   : > { %2111 = vrcp.f32 %v801_v50  ;;  %v2733_v62 = vpop.f32.mrf.mxu2 }
 0x2bd   : > { %1907 = vmatmul.msk.f32.gmra.mxu0 %vm468_vm2, %v2106_v41  ;;  %v1051_v5 = vsel %vm468_vm2, %v2733_v62, -inf }
 0x2be   : > { %1049 = vmax.xlane.f32.xlu0 %v1048_v42 }
 0x2c2   : > { %v2112_v57 = vpop.eup %2111 }
 0x2c4   : > { %v896_v60 = vpop.f32.mrf.mxu0  ;;  %v2737_v36 = vpop.f32.mrf.mxu2 }
 0x2c5   : > { %v920_v63 = vmul.f32 %v2112_v57, %v896_v60  ;;  %1908 = vmatmul.msk.f32.gmra.mxu0 %vm468_vm2, %v2110_v58  ;;  %v1054_v4 = vsel %vm468_vm2, %v2737_v36, -inf  ;;  %v1365_v43 = vpop.xlane.xlu2 %1364 }
 0x2c6   : > { %1385 = vadd.xlane.f32.xlu0 %v1384_v3 }
 0x2c7   : > { %1500 = vrot.lane.b32.xlu1 %v920_v63, %s2216_s22 }
 0x2c9   : > { %v804_v38 = vpop.xlane.xlu0 %803 }
 0x2ca   : > { %2113 = vrcp.f32 %v804_v38 }
 0x2ce   : > { %1052 = vmax.xlane.f32.xlu0 %v1051_v5 }
 0x2d0   : > { %v2114_v1 = vpop.eup %2113 }
 0x2d1   : > { %v807_v61 = vpop.xlane.xlu0 %806 }
 0x2d2   : > { %v899_v31 = vpop.f32.mrf.mxu0  ;;  %2115 = vrcp.f32 %v807_v61 }
 0x2d3   : > { %v921_v7 = vmul.f32 %v2114_v1, %v899_v31 }
 0x2d5   : > { %1502 = vrot.lane.b32.xlu1 %v921_v7, %s2216_s22 }
 0x2d6   : > { %1055 = vmax.xlane.f32.xlu0 %v1054_v4 }
 0x2d8   : > { %v2116_v9 = vpop.eup %2115 }
 0x2d9   : > { %v810_v55 = vpop.xlane.xlu0 %809 }
 0x2da   : > { %v902_v18 = vpop.f32.mrf.mxu0  ;;  %2117 = vrcp.f32 %v810_v55 }
 0x2db   : > { %v922_v47 = vmul.f32 %v2116_v9, %v902_v18 }
 0x2e0   : > { %v2118_v44 = vpop.eup %2117 }
 0x2e1   : > { %v813_v16 = vpop.xlane.xlu0 %812  ;;  %v1368_v24 = vpop.xlane.xlu2 %1367 }
 0x2e2   : > { %v905_v59 = vpop.f32.mrf.mxu0  ;;  %2119 = vrcp.f32 %v813_v16 }
 0x2e3   : > { %v923_v22 = vmul.f32 %v2118_v44, %v905_v59  ;;  %2121 = vrcp.f32 %v819_v17 }
 0x2e8   : > { %v2120_v15 = vpop.eup %2119 }
 0x2e9   : > { %v822_v20 = vpop.xlane.xlu0 %821  ;;  %v2122_v26 = vpop.eup %2121 }
 0x2ea   : > { %v908_v34 = vpop.f32.mrf.mxu0  ;;  %1504 = vrot.lane.b32.xlu0 %v922_v47, %s2216_s22  ;;  %2123 = vrcp.f32 %v822_v20 }
 0x2eb   : > { %v924_v19 = vmul.f32 %v2120_v15, %v908_v34  ;;  %2125 = vrcp.f32 %v1365_v43 }
 0x2f0   : > { %v2124_v37 = vpop.eup %2123 }
 0x2f1   : > { %v2126_v48 = vpop.eup %2125 }
 0x2f2   : > { %v2743_v51 = vpop.f32.mrf.mxu0  ;;  %1506 = vrot.lane.b32.xlu0 %v923_v22, %s2216_s22 }
 0x2fa   : > { %v914_v27 = vpop.f32.mrf.mxu0  ;;  %1508 = vrot.lane.b32.xlu0 %v924_v19, %s2216_s22 }
 0x2fb   : > { %v2747_v30 = vmul.f32 %v2122_v26, %v914_v27 }
 0x301   : > { %v1035_v33 = vpop.xlane.xlu0 %1034 }
 0x302   : > { %v1057_v39 = vsub.f32 %v2676_v52, %v1035_v33  ;;  %v917_v40 = vpop.f32.mrf.mxu0 }
 0x303   : > { %v2750_v41 = vmul.f32 %v2124_v37, %v917_v40  ;;  %v816_v37 = vpop.xlane.xlu1 %815 }
 0x304   : > { %v1065_v45 = vmul.f32 1.442695, %v1057_v39 }
 0x306   : > { %2127 = vpow2.f32 %v1065_v45 }
 0x307   : > { %2129 = vrcp.f32 %v1368_v24 }
 0x308   : > { %v1371_v58 = vpop.xlane.xlu2 %1370 }
 0x309   : > { %v1038_v46 = vpop.xlane.xlu0 %1037 }
 0x30a   : > { %v1058_v53 = vsub.f32 %v2685_v6, %v1038_v46  ;;  %v1460_v54 = vpop.f32.mrf.mxu0 }
 0x30b   : > { %v1484_v56 = vmul.f32 %v2126_v48, %v1460_v54 }
 0x30c   : > { %v2128_v50 = vpop.eup %2127  ;;  %v1067_v42 = vmul.f32 1.442695, %v1058_v53 }
 0x30d   : > { %1564 = vrot.lane.b32.xlu2 %v1484_v56, %s2217_s23  ;;  %1877 = vmatmul.msk.f32.vlgmr.msra.gmra.mxu1 %vm468_vm2, %v2128_v50  ;;  %v1081_v52 = vsel %vm468_vm2, %v2128_v50, 0.0  ;;  %v2130_v60 = vpop.eup %2129 }
 0x30e   : > { %2131 = vpow2.f32 %v1067_v42  ;;  %1082 = vadd.xlane.f32.xlu1 %v1081_v52 }
 0x30f   : > { %2133 = vrcp.f32 %v1371_v58 }
 0x310   : > { %v1374_v31 = vpop.xlane.xlu2 %1373 }
 0x311   : > { %v1041_v57 = vpop.xlane.xlu0 %1040 }
 0x312   : > { %v1059_v63 = vsub.f32 %v2695_v2, %v1041_v57  ;;  %v1463_v6 = vpop.f32.mrf.mxu0 }
 0x313   : > { %v1485_v3 = vmul.f32 %v2130_v60, %v1463_v6 }
 0x314   : > { %v2132_v38 = vpop.eup %2131  ;;  %v1069_v5 = vmul.f32 1.442695, %v1059_v63  ;;  %v623_v63 = vpop.f32.mrf.mxu1 }
 0x315   : > { %1566 = vrot.lane.b32.xlu0 %v1485_v3, %s2217_s23  ;;  %1878 = vmatmul.msk.f32.gmra.mxu1 %vm468_vm2, %v2132_v38  ;;  %v1084_v1 = vsel %vm468_vm2, %v2132_v38, 0.0  ;;  %v2134_v4 = vpop.eup %2133 }
 0x316   : > { %2135 = vpow2.f32 %v1069_v5  ;;  %1085 = vadd.xlane.f32.xlu1 %v1084_v1 }
 0x317   : > { %2137 = vrcp.f32 %v1374_v31 }
 0x319   : > { %v1044_v7 = vpop.xlane.xlu0 %1043 }
 0x31a   : > { %v1060_v61 = vsub.f32 %v2705_v8, %v1044_v7  ;;  %v1466_v18 = vpop.f32.mrf.mxu0 }
 0x31b   : > { %v1486_v2 = vmul.f32 %v2134_v4, %v1466_v18 }
 0x31c   : > { %v2136_v59 = vpop.eup %2135  ;;  %v1071_v55 = vmul.f32 1.442695, %v1060_v61 }
 0x31d   : > { %1568 = vrot.lane.b32.xlu0 %v1486_v2, %s2217_s23  ;;  %1879 = vmatmul.msk.f32.gmra.mxu1 %vm468_vm2, %v2136_v59  ;;  %v1087_v9 = vsel %vm468_vm2, %v2136_v59, 0.0  ;;  %v2138_v34 = vpop.eup %2137 }
 0x31e   : > { %2139 = vpow2.f32 %v1071_v55  ;;  %1088 = vadd.xlane.f32.xlu1 %v1087_v9 }
 0x321   : > { %v2764_v47 = vpop.xlane.xlu0 %1379 }
 0x322   : > { %v1469_v16 = vpop.f32.mrf.mxu0 }
 0x323   : > { %v1487_v44 = vmul.f32 %v2138_v34, %v1469_v16 }
 0x324   : > { %v2140_v22 = vpop.eup %2139 }
 0x325   : > { %1570 = vrot.lane.b32.xlu0 %v1487_v44, %s2217_s23  ;;  %1880 = vmatmul.msk.f32.gmra.mxu1 %vm468_vm2, %v2140_v22  ;;  %v1090_v8 = vsel %vm468_vm2, %v2140_v22, 0.0 }
 0x326   : > { %1091 = vadd.xlane.f32.xlu1 %v1090_v8 }
 0x329   : > { %v1047_v17 = vpop.xlane.xlu0 %1046 }
 0x32a   : > { %v1061_v15 = vsub.f32 %v2714_v12, %v1047_v17  ;;  %v1472_v18 = vpop.f32.mrf.mxu0 }
 0x32c   : > { %v1073_v19 = vmul.f32 1.442695, %v1061_v15 }
 0x32e   : > { %2141 = vpow2.f32 %v1073_v19 }
 0x331   : > { %v1050_v20 = vpop.xlane.xlu0 %1049 }
 0x332   : > { %v1062_v26 = vsub.f32 %v2725_v28, %v1050_v20 }
 0x334   : > { %v2142_v27 = vpop.eup %2141  ;;  %v1075_v43 = vmul.f32 1.442695, %v1062_v26 }
 0x335   : > { %1881 = vmatmul.msk.f32.gmra.mxu1 %vm468_vm2, %v2142_v27  ;;  %v1093_v33 = vsel %vm468_vm2, %v2142_v27, 0.0 }
 0x336   : > { %2143 = vpow2.f32 %v1075_v43  ;;  %1094 = vadd.xlane.f32.xlu1 %v1093_v33  ;;  %v1475_v43 = vpop.f32.mrf.mxu0 }
 0x337   : > { %2145 = vrcp.f32 %v2682_v21 }
 0x339   : > { %v2773_v39 = vpop.xlane.xlu0 %1385  ;;  %v2778_v28 = vpop.permute.xlu1 %1500 }
 0x33c   : > { %v2144_v40 = vpop.eup %2143 }
 0x33d   : > { %1882 = vmatmul.msk.f32.gmra.mxu1 %vm468_vm2, %v2144_v40  ;;  %v1096_v12 = vsel %vm468_vm2, %v2144_v40, 0.0  ;;  %v2146_v46 = vpop.eup %2145 }
 0x33e   : > { %1097 = vadd.xlane.f32.xlu2 %v1096_v12  ;;  %v639_v53 = vmul.f32 %v2146_v46, %v2691_v11 }
 0x341   : > { %v1053_v45 = vpop.xlane.xlu0 %1052 }
 0x342   : > { %v1063_v24 = vsub.f32 %v2733_v62, %v1053_v45 }
 0x344   : > { %v1077_v48 = vmul.f32 1.442695, %v1063_v24 }
 0x346   : > { %2147 = vpow2.f32 %v1077_v48 }
 0x347   : > { %v1503_v54 = vpop.permute.xlu1 %1502 }
 0x348   : > { %v2783_v56 = vsel %vm378_vm1, %v639_v53, %v1503_v54  ;;  %v535_v54 = vsel %vm468_vm2, %v2577_v10, 0.0 }
 0x349   : > { %v1056_v21 = vpop.xlane.xlu0 %1055 }
 0x34a   : > { %v1064_v50 = vsub.f32 %v2737_v36, %v1056_v21  ;;  %v1617_v21 = vld [vmem:[%s2912_s3 + $0x18] sm:$0xff] }
 0x34b   : > { %1658 = vmatpush.msra.mxu2 %v1617_v21 }
 0x34c   : > { %v2148_v42 = vpop.eup %2147  ;;  %v1079_v52 = vmul.f32 1.442695, %v1064_v50 }
 0x34d   : > { %1883 = vmatmul.msk.f32.gmra.mxu1 %vm468_vm2, %v2148_v42  ;;  %v1099_v58 = vsel %vm468_vm2, %v2148_v42, 0.0 }
 0x34e   : > { %2149 = vpow2.f32 %v1079_v52 }
 0x34f   : > { %1100 = vadd.xlane.f32.xlu0 %v1099_v58  ;;  %2151 = vrcp.f32 %v2701_v32  ;;  %v1377_v32 = vpop.xlane.xlu2 %1376  ;;  %v1478_v58 = vpop.f32.mrf.mxu0 }
 0x354   : > { %v2150_v62 = vpop.eup %2149 }
 0x355   : > { %1884 = vmatmul.msk.f32.gmra.mxu1 %vm468_vm2, %v2150_v62  ;;  %v1102_v11 = vsel %vm468_vm2, %v2150_v62, 0.0  ;;  %v2152_v60 = vpop.eup %2151  ;;  %v1616_v62 = vld [vmem:[%s2912_s3 + $0x10] sm:$0xff] }
 0x356   : > { %1103 = vadd.xlane.f32.xlu2 %v1102_v11  ;;  %v641_v6 = vmul.f32 %v2152_v60, %v623_v63  ;;  %1659 = vmatpush.msra.mxu2 %v1616_v62 }
 0x357   : > { %v1383_v46 = vpop.xlane.xlu2 %1382  ;;  %v1481_v10 = vpop.f32.mrf.mxu0 }
 0x35c   : > { %v1505_v57 = vpop.permute.xlu0 %1504 }
 0x35d   : > { %v2793_v36 = vsel %vm378_vm1, %v2703_v29, %v1505_v57  ;;  %v1615_v57 = vld [vmem:[%s2912_s3 + $0x8] sm:$0xff] }
 0x35e   : > { %1660 = vmatpush.msra.mxu2 %v1615_v57 }
 0x364   : > { %v1507_v3 = vpop.permute.xlu0 %1506 }
 0x365   : > { %v2796_v38 = vsel %vm378_vm1, %v641_v6, %v1507_v3 }
 0x367   : > { %v1565_v42 = vpop.permute.xlu2 %1564 }
 0x36c   : > { %v1509_v5 = vpop.permute.xlu0 %1508 }
 0x36d   : > { %v2800_v1 = vsel %vm378_vm1, %v2659_v23, %v1509_v5 }
 0x381   : > { %v1083_v31 = vpop.xlane.xlu1 %1082 }
 0x382   : > { %2153 = vrcp.f32 %v1083_v31 }
 0x383   : > { %2155 = vrcp.f32 %v1377_v32 }
 0x387   : > { %v2810_v27 = vpop.permute.xlu0 %1566 }
 0x388   : > { %v2154_v4 = vpop.eup %2153 }
 0x389   : > { %v1086_v7 = vpop.xlane.xlu1 %1085  ;;  %v2156_v2 = vpop.eup %2155 }
 0x38a   : > { %v1178_v61 = vpop.f32.mrf.mxu1  ;;  %2157 = vrcp.f32 %v1086_v7  ;;  %v1488_v23 = vmul.f32 %v2156_v2, %v1472_v18 }
 0x38b   : > { %v1202_v29 = vmul.f32 %v2154_v4, %v1178_v61  ;;  %2159 = vrcp.f32 %v816_v37 }
 0x38d   : > { %1532 = vrot.lane.b32.xlu0 %v1202_v29, %s2218_s24 }
 0x390   : > { %v2158_v55 = vpop.eup %2157 }
 0x391   : > { %v1089_v59 = vpop.xlane.xlu1 %1088  ;;  %v2160_v16 = vpop.eup %2159 }
 0x392   : > { %v1181_v9 = vpop.f32.mrf.mxu1  ;;  %2161 = vrcp.f32 %v1089_v59  ;;  %v925_v17 = vmul.f32 %v2160_v16, %v2743_v51  ;;  %v2813_v51 = vpop.permute.xlu0 %1568 }
 0x393   : > { %v1203_v34 = vmul.f32 %v2158_v55, %v1181_v9 }
 0x395   : > { %1572 = vrot.lane.b32.xlu0 %v1488_v23, %s2217_s23  ;;  %1534 = vrot.lane.b32.xlu2 %v1203_v34, %s2218_s24 }
 0x398   : > { %v2162_v22 = vpop.eup %2161 }
 0x399   : > { %v1092_v44 = vpop.xlane.xlu1 %1091 }
 0x39a   : > { %v1184_v8 = vpop.f32.mrf.mxu1  ;;  %2163 = vrcp.f32 %v1092_v44 }
 0x39b   : > { %v1204_v15 = vmul.f32 %v2162_v22, %v1184_v8  ;;  %2165 = vrcp.f32 %v2764_v47  ;;  %v2818_v47 = vpop.permute.xlu0 %1570 }
 0x39d   : > { %1510 = vrot.lane.b32.xlu0 %v925_v17, %s2216_s22  ;;  %1536 = vrot.lane.b32.xlu2 %v1204_v15, %s2218_s24 }
 0x3a0   : > { %v2164_v19 = vpop.eup %2163 }
 0x3a1   : > { %v2166_v37 = vpop.eup %2165 }
 0x3a2   : > { %v1187_v20 = vpop.f32.mrf.mxu1  ;;  %v1489_v40 = vmul.f32 %v2166_v37, %v1475_v43 }
 0x3a3   : > { %v1205_v26 = vmul.f32 %v2164_v19, %v1187_v20 }
 0x3a5   : > { %1538 = vrot.lane.b32.xlu0 %v1205_v26, %s2218_s24 }
 0x3a9   : > { %v1095_v33 = vpop.xlane.xlu1 %1094 }
 0x3aa   : > { %2167 = vrcp.f32 %v1095_v33 }
 0x3ad   : > { %1574 = vrot.lane.b32.xlu0 %v1489_v40, %s2217_s23 }
 0x3b0   : > { %v2168_v12 = vpop.eup %2167 }
 0x3b1   : > { %v1098_v11 = vpop.xlane.xlu2 %1097 }
 0x3b2   : > { %v1190_v45 = vpop.f32.mrf.mxu1 }
 0x3b3   : > { %v1206_v24 = vmul.f32 %v2168_v12, %v1190_v45 }
 0x3b5   : > { %1512 = vrot.lane.b32.xlu0 %v2747_v30, %s2216_s22  ;;  %1540 = vrot.lane.b32.xlu1 %v1206_v24, %s2218_s24 }
 0x3ba   : > { %v1193_v48 = vpop.f32.mrf.mxu1 }
 0x3c2   : > { %v1101_v53 = vpop.xlane.xlu0 %1100 }
 0x3c3   : > { %2169 = vrcp.f32 %v1101_v53 }
 0x3c4   : > { %2171 = vrcp.f32 %v2773_v39  ;;  %v538_v39 = vsel %vm468_vm2, %v2586_v14, 0.0 }
 0x3c5   : > { %2173 = vrcp.f32 %v1098_v11 }
 0x3c6   : > { %536 = vadd.xlane.f32.xlu2 %v535_v54  ;;  %2175 = vrcp.f32 %v1383_v46 }
 0x3c9   : > { %v2170_v50 = vpop.eup %2169  ;;  %v1104_v5 = vpop.xlane.xlu2 %1103 }
 0x3ca   : > { %v1196_v30 = vpop.f32.mrf.mxu1  ;;  %v2172_v60 = vpop.eup %2171  ;;  %2177 = vrcp.f32 %v1104_v5 }
 0x3cb   : > { %v1208_v52 = vmul.f32 %v2170_v50, %v1196_v30  ;;  %v2174_v63 = vpop.eup %2173  ;;  %v1491_v6 = vmul.f32 %v2172_v60, %v1481_v10  ;;  %2179 = vrcp.f32 %v2719_v13 }
 0x3cc   : > { %v1207_v3 = vmul.f32 %v2174_v63, %v1193_v48  ;;  %v2176_v31 = vpop.eup %2175 }
 0x3cd   : > { %1544 = vrot.lane.b32.xlu0 %v1208_v52, %s2218_s24  ;;  %v1490_v32 = vmul.f32 %v2176_v31, %v1478_v58 }
 0x3d0   : > { %v2178_v4 = vpop.eup %2177 }
 0x3d1   : > { %v2180_v14 = vpop.eup %2179 }
 0x3d2   : > { %v1199_v7 = vpop.f32.mrf.mxu1  ;;  %v638_v29 = vmul.f32 %v2180_v14, %v2673_v25 }
 0x3d3   : > { %v1209_v61 = vmul.f32 %v2178_v4, %v1199_v7 }
 0x3d4   : > { %v1588_v18 = vsel %vm378_vm1, %v638_v29, %v2778_v28 }
 0x3d5   : > { %1514 = vrot.lane.b32.xlu0 %v2750_v41, %s2216_s22  ;;  %v1614_v41 = vld [vmem:[%s2912_s3] sm:$0xff] }
 0x3d6   : > { %1661 = vmatpush.msra.mxu2 %v1614_v41 }
 0x3dd   : > { %1578 = vrot.lane.b32.xlu0 %v1491_v6, %s2217_s23 }
 0x3de   : > { %1542 = vrot.lane.b32.xlu2 %v1207_v3, %s2218_s24 }
 0x3df   : > { %539 = vadd.xlane.f32.xlu1 %v538_v39 }
 0x3e6   : > { %1576 = vrot.lane.b32.xlu2 %v1490_v32, %s2217_s23 }
 0x3ee   : > { %1546 = vrot.lane.b32.xlu2 %v1209_v61, %s2218_s24 }
 0x3ef   : > { %v1535_v55 = vpop.permute.xlu2 %1534 }
 0x3f0   : > { %v1598_v23 = vsel %vm1596_vm3, %v2783_v56, %v1535_v55 }
 0x3f1   : > { %v1607_v25 = vsel %vm1605_vm4, %v1598_v23, %v2810_v27 }
 0x3f7   : > { %v1537_v28 = vpop.permute.xlu2 %1536 }
 0x3f8   : > { %v1599_v34 = vsel %vm1596_vm3, %v2793_v36, %v1537_v28 }
 0x3f9   : > { %v1608_v44 = vsel %vm1605_vm4, %v1599_v34, %v2813_v51 }
 0x3ff   : > { %v1533_v2 = vpop.permute.xlu0 %1532 }
 0x400   : > { %v1597_v59 = vsel %vm1596_vm3, %v1588_v18, %v1533_v2 }
 0x401   : > { %v1606_v9 = vsel %vm1605_vm4, %v1597_v59, %v1565_v42  ;;  %v2056_v42 = vld [vmem:[%s2913_s4] ss:$0 sm:$0xff] }
 0x402   : > { %1909 = vmatmul.msk.f32.vlgmr.msra.gmra.mxu2 %vm304_vm0, %v1606_v9 }
 0x407   : > { %v1573_v13 = vpop.permute.xlu0 %1572 }
 0x40a   : > { %1910 = vmatmul.msk.f32.gmra.mxu2 %vm304_vm0, %v1607_v25 }
 0x40f   : > { %v1511_v16 = vpop.permute.xlu0 %1510 }
 0x412   : > { %1911 = vmatmul.msk.f32.gmra.mxu2 %vm304_vm0, %v1608_v44 }
 0x417   : > { %v1539_v22 = vpop.permute.xlu0 %1538 }
 0x418   : > { %v1600_v56 = vsel %vm1596_vm3, %v2796_v38, %v1539_v22  ;;  %v1593_v38 = vsel %vm378_vm1, %v2717_v49, %v1511_v16 }
 0x419   : > { %v1609_v8 = vsel %vm1605_vm4, %v1600_v56, %v2818_v47 }
 0x41a   : > { %1912 = vmatmul.msk.f32.gmra.mxu2 %vm304_vm0, %v1609_v8 }
 0x41f   : > { %v1575_v19 = vpop.permute.xlu0 %1574 }
 0x427   : > { %v1541_v17 = vpop.permute.xlu1 %1540  ;;  %v1513_v27 = vpop.permute.xlu0 %1512 }
 0x428   : > { %v1601_v15 = vsel %vm1596_vm3, %v2800_v1, %v1541_v17 }
 0x429   : > { %v1610_v36 = vsel %vm1605_vm4, %v1601_v15, %v1573_v13 }
 0x42a   : > { %1913 = vmatmul.msk.f32.gmra.mxu2 %vm304_vm0, %v1610_v36 }
 0x439   : > { %v537_v20 = vpop.xlane.xlu2 %536 }
 0x43a   : > { %2181 = vrcp.f32 %v537_v20 }
 0x43f   : > { %v1545_v51 = vpop.permute.xlu0 %1544 }
 0x440   : > { %v2182_v26 = vpop.eup %2181 }
 0x441   : > { %v1543_v43 = vpop.permute.xlu2 %1542  ;;  %v644_v33 = vmul.f32 %v2182_v26, %v2665_v0 }
 0x442   : > { %v1602_v37 = vsel %vm1596_vm3, %v1593_v38, %v1543_v43 }
 0x443   : > { %v1611_v40 = vsel %vm1605_vm4, %v1602_v37, %v1575_v19  ;;  %v1594_v1 = vsel %vm378_vm1, %v644_v33, %v1513_v27 }
 0x444   : > { %1914 = vmatmul.msk.f32.gmra.mxu2 %vm304_vm0, %v1611_v40  ;;  %v1603_v12 = vsel %vm1596_vm3, %v1594_v1, %v1545_v51 }
 0x447   : > { %v1515_v47 = vpop.permute.xlu0 %1514 }
 0x449   : > { %v1577_v45 = vpop.permute.xlu2 %1576 }
 0x44a   : > { %v1612_v24 = vsel %vm1605_vm4, %v1603_v12, %v1577_v45 }
 0x44c   : > { %1915 = vmatmul.msk.f32.gmra.mxu2 %vm304_vm0, %v1612_v24 }
 0x44f   : > { %v1579_v54 = vpop.permute.xlu0 %1578 }
 0x451   : > { %v1547_v48 = vpop.permute.xlu2 %1546 }
 0x452   : > { %v540_v49 = vpop.xlane.xlu1 %539 }
 0x453   : > { %2183 = vrcp.f32 %v540_v49 }
 0x459   : > { %v2184_v0 = vpop.eup %2183 }
 0x45a   : > { %v645_v46 = vmul.f32 %v2184_v0, %v2669_v35 }
 0x45c   : > { %v1595_v53 = vsel %vm378_vm1, %v645_v46, %v1515_v47 }
 0x45d   : > { %v1604_v21 = vsel %vm1596_vm3, %v1595_v53, %v1547_v48 }
 0x45e   : > { %v1613_v50 = vsel %vm1605_vm4, %v1604_v21, %v1579_v54 }
 0x45f   : > { %1916 = vmatmul.msk.f32.gmra.mxu2 %vm304_vm0, %v1613_v50 }
 0x485   : > { %v1663_v30 = vpop.f32.mrf.mxu2 }
 0x486   : > { %v1664_v35 = vadd.f32 %v2056_v42, %v1663_v30 }
 0x488   : > { %1687 = vst.msk [vmem:[%s282_s13] sm:$0xff] %vm304_vm0, %v1664_v35 }
 0x48d   : > { %v1666_v52 = vpop.f32.mrf.mxu2 }
 0x48e   : > { %v1667_v58 = vadd.f32 %v2056_v42, %v1666_v52 }
 0x490   : > { %1688 = vst.msk [vmem:[%s282_s13 + $0x8] sm:$0xff] %vm304_vm0, %v1667_v58 }
 0x495   : > { %v1669_v62 = vpop.f32.mrf.mxu2 }
 0x496   : > { %v1670_v11 = vadd.f32 %v2056_v42, %v1669_v62 }
 0x498   : > { %1689 = vst.msk [vmem:[%s282_s13 + $0x10] sm:$0xff] %vm304_vm0, %v1670_v11 }
 0x49d   : > { %v1672_v10 = vpop.f32.mrf.mxu2 }
 0x49e   : > { %v1673_v57 = vadd.f32 %v2056_v42, %v1672_v10 }
 0x4a0   : > { %1690 = vst.msk [vmem:[%s282_s13 + $0x18] sm:$0xff] %vm304_vm0, %v1673_v57 }
 0x4ad   : > { %v1675_v60 = vpop.f32.mrf.mxu2 }
 0x4ae   : > { %v1676_v63 = vadd.f32 %v2056_v42, %v1675_v60 }
 0x4b0   : > { %1691 = vst.msk [vmem:[%s282_s13 + $0x20] sm:$0xff] %vm304_vm0, %v1676_v63 }
 0x4c7   : > { %v1678_v6 = vpop.f32.mrf.mxu2 }
 0x4c8   : > { %v1679_v3 = vadd.f32 %v2056_v42, %v1678_v6 }
 0x4ca   : > { %1692 = vst.msk [vmem:[%s282_s13 + $0x28] sm:$0xff] %vm304_vm0, %v1679_v3 }
 0x4cf   : > { %v1681_v39 = vpop.f32.mrf.mxu2 }
 0x4d0   : > { %v1682_v41 = vadd.f32 %v2056_v42, %v1681_v39 }
 0x4d2   : > { %1693 = vst.msk [vmem:[%s282_s13 + $0x30] sm:$0xff] %vm304_vm0, %v1682_v41 }
 0x4e2   : > { %v1684_v5 = vpop.f32.mrf.mxu2 }
 0x4e3   : > { %v1685_v31 = vadd.f32 %v2056_v42, %v1684_v5 }
 0x4e5   : > { %1694 = vst.msk [vmem:[%s282_s13 + $0x38] sm:$0xff] %vm304_vm0, %v1685_v31 }
 0x4e6 PF: > { %s15_s20 = sadd.s32 1, %s2207_s20   ;;  %s2915_s18 = smov %s2203_s19 }
 0x4e7   : > { %p12_p5 = scmp.ge.s32.totalorder %s15_s20, 4   ;;  %s2916_s19 = smov %s2918_s21 }
 0x4e9   :  { %14 = sbr.rel (!%p12_p5) target bundleno = 2 (0x2), region = 73 }

</bundles_post_ra>
